<compile_context>
chip_gen: v5e
topology: v5e:2x2
jax: 0.10.0
libtpu: 0.0.40
codegen_flags: <defaults>
</compile_context>

<pallas_src>
import jax
import jax.numpy as jnp
from jax.experimental import pallas as pl
from jax.experimental.pallas import tpu as pltpu

HIDDEN = 512       # fixed by the module definition
BN_EPS = 1e-5      # nn.BatchNorm1d default
COMPUTE_DTYPE = jnp.bfloat16


def binary_encoder_kernel(x_ref,
                          w1_ref, b1_ref,
                          w2_ref, b2_ref,
                          w3_ref, b3_ref,
                          w4_ref, b4_ref,
                          out_ref):
    # ---------------- encoder ----------------
    # Linear + (folded) BatchNorm + ReLU.  Dropout(0.2) is identity in eval.
    h = jnp.dot(x_ref[...], w1_ref[...], preferred_element_type=jnp.float32)
    h = jnp.maximum(h + b1_ref[...], 0.0)

    h = jnp.dot(h.astype(COMPUTE_DTYPE), w2_ref[...],
                preferred_element_type=jnp.float32)
    h = jnp.maximum(h + b2_ref[...], 0.0)          # compressed embedding

    # ---------------- decoder ----------------
    h = jnp.dot(h.astype(COMPUTE_DTYPE), w3_ref[...],
                preferred_element_type=jnp.float32)
    h = jnp.maximum(h + b3_ref[...], 0.0)

    h = jnp.dot(h.astype(COMPUTE_DTYPE), w4_ref[...],
                preferred_element_type=jnp.float32)
    h = h + b4_ref[...]
    # Sigmoid: exp + approx reciprocal both run on the EUP slot.
    out_ref[...] = pl.reciprocal(1.0 + jnp.exp(-h), approx=True).astype(out_ref.dtype)


def _fold_bn(w, b, gamma, beta, mean, var):
    """Fold eval-mode BatchNorm into the preceding Linear's weights/bias."""
    scale = gamma / jnp.sqrt(var + BN_EPS)
    shift = beta - mean * scale
    return w * scale[None, :], b * scale + shift


def fold_and_cast(params):
    """Returns (bf16 weights, f32 (1,N) biases) with BN folded into layers 1-3."""
    w1, b1 = _fold_bn(params["w1"], params["b1"], *params["bn1"])
    w2, b2 = _fold_bn(params["w2"], params["b2"], *params["bn2"])
    w3, b3 = _fold_bn(params["w3"], params["b3"], *params["bn3"])
    w4, b4 = params["w4"], params["b4"]
    ws = [w.astype(COMPUTE_DTYPE) for w in (w1, w2, w3, w4)]
    bs = [b.astype(jnp.float32).reshape(1, -1) for b in (b1, b2, b3, b4)]
    return ws, bs


def _choose_block_b(b, requested):
    """Batch tile: multiple of 8, divides b, and keeps >=2 grid steps when possible."""
    if b <= 8:
        return b
    bb = min(requested, b)
    if b >= 16:
        bb = min(bb, b // 2)           # keep >= 2 steps so v7x's 2nd TC has work
    bb = max(8, (bb // 8) * 8)
    while bb > 8 and b % bb != 0:
        bb -= 8
    if b % bb != 0:
        return b                       # fall back: single full-batch tile
    return bb


def binary_encoder_forward(x, params, *, block_b=256):
    """Eval-mode BinaryEncoder forward. x: [B, F] float32. Returns [B, F] float32."""
    b, features = x.shape
    hidden = params["w1"].shape[1]
    emb = params["w2"].shape[1]

    ws, bs = fold_and_cast(params)
    block_b = _choose_block_b(b, block_b)

    flat_inputs = (
        x.astype(COMPUTE_DTYPE),
        ws[0], bs[0],
        ws[1], bs[1],
        ws[2], bs[2],
        ws[3], bs[3],
    )

    def resident(shape):
        # Same block index every grid step -> stays resident in VMEM (no re-DMA).
        return pl.BlockSpec(shape, lambda i: (0,) * len(shape))

    in_specs = [
        pl.BlockSpec((block_b, features), lambda i: (i, 0)),       # x tile
        resident((features, hidden)), resident((1, hidden)),       # W1', b1'
        resident((hidden, emb)), resident((1, emb)),               # W2', b2'
        resident((emb, hidden)), resident((1, hidden)),            # W3', b3'
        resident((hidden, features)), resident((1, features)),     # W4,  b4
    ]

    return pl.pallas_call(
        binary_encoder_kernel,
        out_shape=jax.ShapeDtypeStruct((b, features), jnp.float32),
        grid=(pl.cdiv(b, block_b),),
        in_specs=in_specs,
        out_specs=pl.BlockSpec((block_b, features), lambda i: (i, 0)),
        compiler_params=pltpu.CompilerParams(
            dimension_semantics=("parallel",),
        ),
    )(*flat_inputs)


# ------------------------- references for testing -------------------------

def reference_f32(x, params):
    """Full-precision, un-folded reference (the PyTorch eval-mode spec)."""
    def bn(h, gamma, beta, mean, var):
        return (h - mean) / jnp.sqrt(var + BN_EPS) * gamma + beta

    h = x @ params["w1"] + params["b1"]
    h = jnp.maximum(bn(h, *params["bn1"]), 0.0)
    h = h @ params["w2"] + params["b2"]
    h = jnp.maximum(bn(h, *params["bn2"]), 0.0)
    h = h @ params["w3"] + params["b3"]
    h = jnp.maximum(bn(h, *params["bn3"]), 0.0)
    h = h @ params["w4"] + params["b4"]
    return 1.0 / (1.0 + jnp.exp(-h))


def reference_like_kernel(x, params):
    """Same folded-BN / bf16-matmul math as the kernel, in plain JAX."""
    ws, bs = fold_and_cast(params)
    h = x.astype(COMPUTE_DTYPE)
    for i in range(3):
        h = jnp.dot(h, ws[i], preferred_element_type=jnp.float32) + bs[i]
        h = jnp.maximum(h, 0.0).astype(COMPUTE_DTYPE)
    h = jnp.dot(h, ws[3], preferred_element_type=jnp.float32) + bs[3]
    return 1.0 / (1.0 + jnp.exp(-h))


if __name__ == "__main__":
    B, FEATURES, EMB = 64, 256, 128

    key = jax.random.PRNGKey(0)
    keys = jax.random.split(key, 24)

    def linear_init(kw, kb, fan_in, fan_out):
        bound = 1.0 / (fan_in ** 0.5)
        w = jax.random.uniform(kw, (fan_in, fan_out), jnp.float32, -bound, bound)
        b = jax.random.uniform(kb, (fan_out,), jnp.float32, -bound, bound)
        return w, b

    def bn_init(kg, kb, km, kv, dim):
        gamma = 1.0 + 0.1 * jax.random.normal(kg, (dim,), jnp.float32)
        beta = 0.1 * jax.random.normal(kb, (dim,), jnp.float32)
        mean = 0.1 * jax.random.normal(km, (dim,), jnp.float32)
        var = jax.random.uniform(kv, (dim,), jnp.float32, 0.5, 1.5)
        return gamma, beta, mean, var

    # Binary-ish input features in [0, 1).
    x = jax.random.uniform(keys[0], (B, FEATURES), dtype=jnp.float32)

    w1, b1 = linear_init(keys[1], keys[2], FEATURES, HIDDEN)
    w2, b2 = linear_init(keys[3], keys[4], HIDDEN, EMB)
    w3, b3 = linear_init(keys[5], keys[6], EMB, HIDDEN)
    w4, b4 = linear_init(keys[7], keys[8], HIDDEN, FEATURES)

    params = {
        "w1": w1, "b1": b1, "bn1": bn_init(keys[9], keys[10], keys[11], keys[12], HIDDEN),
        "w2": w2, "b2": b2, "bn2": bn_init(keys[13], keys[14], keys[15], keys[16], EMB),
        "w3": w3, "b3": b3, "bn3": bn_init(keys[17], keys[18], keys[19], keys[20], HIDDEN),
        "w4": w4, "b4": b4,
    }

    out = binary_encoder_forward(x, params)
    jax.block_until_ready(out)
    assert out.shape == (B, FEATURES)

    # Tight check: same folded/bf16 math (tolerates the EUP approx reciprocal).
    ref_k = reference_like_kernel(x, params)
    err_k = jnp.max(jnp.abs(out - ref_k))
    assert jnp.allclose(out, ref_k, atol=2e-3, rtol=0), f"kernel-math max err {err_k}"

    # Loose check: against the full-f32 PyTorch-spec reference (bf16 weight quantization).
    ref_f = reference_f32(x, params)
    err_f = jnp.max(jnp.abs(out - ref_f))
    assert jnp.allclose(out, ref_f, atol=5e-2, rtol=0), f"spec max err {err_f}"

    print("KERNEL_OK")
</pallas_src>

<mosaic_0001>
module attributes {stable_mosaic.version = 11 : i64} {
  func.func @binary_encoder_kernel(%arg0: i32, %arg1: memref<32x256xbf16, #tpu.memory_space<vmem>>, %arg2: memref<256x512xbf16, #tpu.memory_space<vmem>>, %arg3: memref<1x512xf32, #tpu.memory_space<vmem>>, %arg4: memref<512x128xbf16, #tpu.memory_space<vmem>>, %arg5: memref<1x128xf32, #tpu.memory_space<vmem>>, %arg6: memref<128x512xbf16, #tpu.memory_space<vmem>>, %arg7: memref<1x512xf32, #tpu.memory_space<vmem>>, %arg8: memref<512x256xbf16, #tpu.memory_space<vmem>>, %arg9: memref<1x256xf32, #tpu.memory_space<vmem>>, %arg10: memref<32x256xf32, #tpu.memory_space<vmem>>) attributes {dimension_semantics = [#tpu.dimension_semantics<parallel>], iteration_bounds = array<i64: 2>, scalar_prefetch = 0 : i64, scratch_operands = 0 : i64, tpu.core_type = #tpu.core_type<tc>, window_params = [{transform_indices = @transform_0, window_bounds = array<i64: 32, 256>}, {pipeline_mode = #tpu.pipeline_mode<synchronous>, transform_indices = @transform_1, window_bounds = array<i64: 256, 512>}, {pipeline_mode = #tpu.pipeline_mode<synchronous>, transform_indices = @transform_2, window_bounds = array<i64: 1, 512>}, {pipeline_mode = #tpu.pipeline_mode<synchronous>, transform_indices = @transform_3, window_bounds = array<i64: 512, 128>}, {pipeline_mode = #tpu.pipeline_mode<synchronous>, transform_indices = @transform_4, window_bounds = array<i64: 1, 128>}, {pipeline_mode = #tpu.pipeline_mode<synchronous>, transform_indices = @transform_5, window_bounds = array<i64: 128, 512>}, {pipeline_mode = #tpu.pipeline_mode<synchronous>, transform_indices = @transform_6, window_bounds = array<i64: 1, 512>}, {pipeline_mode = #tpu.pipeline_mode<synchronous>, transform_indices = @transform_7, window_bounds = array<i64: 512, 256>}, {pipeline_mode = #tpu.pipeline_mode<synchronous>, transform_indices = @transform_8, window_bounds = array<i64: 1, 256>}, {transform_indices = @transform_9, window_bounds = array<i64: 32, 256>}]} {
    %c0 = arith.constant 0 : index
    %c0_0 = arith.constant 0 : index
    %0 = vector.load %arg1[%c0, %c0_0] : memref<32x256xbf16, #tpu.memory_space<vmem>>, vector<32x256xbf16>
    %c0_1 = arith.constant 0 : index
    %c0_2 = arith.constant 0 : index
    %1 = vector.load %arg2[%c0_1, %c0_2] : memref<256x512xbf16, #tpu.memory_space<vmem>>, vector<256x512xbf16>
    %cst = arith.constant dense<0.000000e+00> : vector<32x512xf32>
    %2 = tpu.matmul %0, %1, %cst {dimension_numbers = #tpu.dot_dimension_numbers<[1], [0], [0], [1], [0, 0, 1, 1], [], []>} : vector<32x256xbf16>, vector<256x512xbf16>, vector<32x512xf32> -> vector<32x512xf32>
    %c0_3 = arith.constant 0 : index
    %c0_4 = arith.constant 0 : index
    %3 = vector.load %arg3[%c0_3, %c0_4] : memref<1x512xf32, #tpu.memory_space<vmem>>, vector<1x512xf32>
    %4 = vector.broadcast %3 : vector<1x512xf32> to vector<32x512xf32>
    %5 = arith.addf %2, %4 : vector<32x512xf32>
    %cst_5 = arith.constant 0.000000e+00 : f32
    %6 = vector.broadcast %cst_5 : f32 to vector<32x512xf32>
    %7 = arith.maximumf %5, %6 : vector<32x512xf32>
    %8 = arith.truncf %7 : vector<32x512xf32> to vector<32x512xbf16>
    %c0_6 = arith.constant 0 : index
    %c0_7 = arith.constant 0 : index
    %9 = vector.load %arg4[%c0_6, %c0_7] : memref<512x128xbf16, #tpu.memory_space<vmem>>, vector<512x128xbf16>
    %cst_8 = arith.constant dense<0.000000e+00> : vector<32x128xf32>
    %10 = tpu.matmul %8, %9, %cst_8 {dimension_numbers = #tpu.dot_dimension_numbers<[1], [0], [0], [1], [0, 0, 1, 1], [], []>} : vector<32x512xbf16>, vector<512x128xbf16>, vector<32x128xf32> -> vector<32x128xf32>
    %c0_9 = arith.constant 0 : index
    %c0_10 = arith.constant 0 : index
    %11 = vector.load %arg5[%c0_9, %c0_10] : memref<1x128xf32, #tpu.memory_space<vmem>>, vector<1x128xf32>
    %12 = vector.broadcast %11 : vector<1x128xf32> to vector<32x128xf32>
    %13 = arith.addf %10, %12 : vector<32x128xf32>
    %cst_11 = arith.constant 0.000000e+00 : f32
    %14 = vector.broadcast %cst_11 : f32 to vector<32x128xf32>
    %15 = arith.maximumf %13, %14 : vector<32x128xf32>
    %16 = arith.truncf %15 : vector<32x128xf32> to vector<32x128xbf16>
    %c0_12 = arith.constant 0 : index
    %c0_13 = arith.constant 0 : index
    %17 = vector.load %arg6[%c0_12, %c0_13] : memref<128x512xbf16, #tpu.memory_space<vmem>>, vector<128x512xbf16>
    %cst_14 = arith.constant dense<0.000000e+00> : vector<32x512xf32>
    %18 = tpu.matmul %16, %17, %cst_14 {dimension_numbers = #tpu.dot_dimension_numbers<[1], [0], [0], [1], [0, 0, 1, 1], [], []>} : vector<32x128xbf16>, vector<128x512xbf16>, vector<32x512xf32> -> vector<32x512xf32>
    %c0_15 = arith.constant 0 : index
    %c0_16 = arith.constant 0 : index
    %19 = vector.load %arg7[%c0_15, %c0_16] : memref<1x512xf32, #tpu.memory_space<vmem>>, vector<1x512xf32>
    %20 = vector.broadcast %19 : vector<1x512xf32> to vector<32x512xf32>
    %21 = arith.addf %18, %20 : vector<32x512xf32>
    %cst_17 = arith.constant 0.000000e+00 : f32
    %22 = vector.broadcast %cst_17 : f32 to vector<32x512xf32>
    %23 = arith.maximumf %21, %22 : vector<32x512xf32>
    %24 = arith.truncf %23 : vector<32x512xf32> to vector<32x512xbf16>
    %c0_18 = arith.constant 0 : index
    %c0_19 = arith.constant 0 : index
    %25 = vector.load %arg8[%c0_18, %c0_19] : memref<512x256xbf16, #tpu.memory_space<vmem>>, vector<512x256xbf16>
    %cst_20 = arith.constant dense<0.000000e+00> : vector<32x256xf32>
    %26 = tpu.matmul %24, %25, %cst_20 {dimension_numbers = #tpu.dot_dimension_numbers<[1], [0], [0], [1], [0, 0, 1, 1], [], []>} : vector<32x512xbf16>, vector<512x256xbf16>, vector<32x256xf32> -> vector<32x256xf32>
    %c0_21 = arith.constant 0 : index
    %c0_22 = arith.constant 0 : index
    %27 = vector.load %arg9[%c0_21, %c0_22] : memref<1x256xf32, #tpu.memory_space<vmem>>, vector<1x256xf32>
    %28 = vector.broadcast %27 : vector<1x256xf32> to vector<32x256xf32>
    %29 = arith.addf %26, %28 : vector<32x256xf32>
    %cst_23 = arith.constant 0.000000e+00 : f32
    %30 = vector.broadcast %cst_23 : f32 to vector<32x256xf32>
    %31 = arith.subf %30, %29 : vector<32x256xf32>
    %32 = math.exp %31 : vector<32x256xf32>
    %cst_24 = arith.constant 1.000000e+00 : f32
    %33 = vector.broadcast %cst_24 : f32 to vector<32x256xf32>
    %34 = arith.addf %33, %32 : vector<32x256xf32>
    %35 = tpu.reciprocal %34 {approx = true} : vector<32x256xf32> -> vector<32x256xf32>
    %c0_25 = arith.constant 0 : index
    %c0_26 = arith.constant 0 : index
    %36 = vector.load %arg10[%c0_25, %c0_26] : memref<32x256xf32, #tpu.memory_space<vmem>>, vector<32x256xf32>
    tpu.vector_store %arg10[%c0_25, %c0_26], %35 {strides = array<i32>} : memref<32x256xf32, #tpu.memory_space<vmem>>, vector<32x256xf32>,
    return
  }
  func.func @transform_0(%arg0: i32) -> (i32, i32) {
    %c0_i32 = arith.constant 0 : i32
    %c0_i32_0 = arith.constant 0 : i32
    return %arg0, %c0_i32 : i32, i32
  }
  func.func @transform_1(%arg0: i32) -> (i32, i32) {
    %c0_i32 = arith.constant 0 : i32
    %c0_i32_0 = arith.constant 0 : i32
    %c0_i32_1 = arith.constant 0 : i32
    return %c0_i32, %c0_i32_0 : i32, i32
  }
  func.func @transform_2(%arg0: i32) -> (i32, i32) {
    %c0_i32 = arith.constant 0 : i32
    %c0_i32_0 = arith.constant 0 : i32
    %c0_i32_1 = arith.constant 0 : i32
    return %c0_i32, %c0_i32_0 : i32, i32
  }
  func.func @transform_3(%arg0: i32) -> (i32, i32) {
    %c0_i32 = arith.constant 0 : i32
    %c0_i32_0 = arith.constant 0 : i32
    %c0_i32_1 = arith.constant 0 : i32
    return %c0_i32, %c0_i32_0 : i32, i32
  }
  func.func @transform_4(%arg0: i32) -> (i32, i32) {
    %c0_i32 = arith.constant 0 : i32
    %c0_i32_0 = arith.constant 0 : i32
    %c0_i32_1 = arith.constant 0 : i32
    return %c0_i32, %c0_i32_0 : i32, i32
  }
  func.func @transform_5(%arg0: i32) -> (i32, i32) {
    %c0_i32 = arith.constant 0 : i32
    %c0_i32_0 = arith.constant 0 : i32
    %c0_i32_1 = arith.constant 0 : i32
    return %c0_i32, %c0_i32_0 : i32, i32
  }
  func.func @transform_6(%arg0: i32) -> (i32, i32) {
    %c0_i32 = arith.constant 0 : i32
    %c0_i32_0 = arith.constant 0 : i32
    %c0_i32_1 = arith.constant 0 : i32
    return %c0_i32, %c0_i32_0 : i32, i32
  }
  func.func @transform_7(%arg0: i32) -> (i32, i32) {
    %c0_i32 = arith.constant 0 : i32
    %c0_i32_0 = arith.constant 0 : i32
    %c0_i32_1 = arith.constant 0 : i32
    return %c0_i32, %c0_i32_0 : i32, i32
  }
  func.func @transform_8(%arg0: i32) -> (i32, i32) {
    %c0_i32 = arith.constant 0 : i32
    %c0_i32_0 = arith.constant 0 : i32
    %c0_i32_1 = arith.constant 0 : i32
    return %c0_i32, %c0_i32_0 : i32, i32
  }
  func.func @transform_9(%arg0: i32) -> (i32, i32) {
    %c0_i32 = arith.constant 0 : i32
    %c0_i32_0 = arith.constant 0 : i32
    return %arg0, %c0_i32 : i32, i32
  }
}

</mosaic_0001>

<bundles_post_ra>
// kernel: tpu_custom_call.1
= control target key start
LH: loop header
LB: loop body
LE: loop exit
PB: predicated region body
PF: predicated region fallthrough
CT: control target
= control target key end

     0   :  { %s4215_s0 = inlined_call_operand.hbm [shape: bf16[64,256], index: 0, kind: input, shape index: {}]   ;;  %s4216_s1 = inlined_call_operand.hbm [shape: bf16[256,512], index: 1, kind: input, shape index: {}]   ;;  %s4217_s2 = inlined_call_operand.hbm [shape: f32[1,512], index: 2, kind: input, shape index: {}]   ;;  %s4218_s3 = inlined_call_operand.hbm [shape: bf16[512,128], index: 3, kind: input, shape index: {}]   ;;  %s4219_s4 = inlined_call_operand.hbm [shape: f32[1,128], index: 4, kind: input, shape index: {}]   ;;  %s4220_s5 = inlined_call_operand.hbm [shape: bf16[128,512], index: 5, kind: input, shape index: {}]   ;;  %s4221_s6 = inlined_call_operand.vmem [shape: f32[1,512], index: 6, kind: input, shape index: {}]   ;;  %s4222_s7 = inlined_call_operand.hbm [shape: bf16[512,256], index: 7, kind: input, shape index: {}]   ;;  %s4223_s8 = inlined_call_operand.vmem [shape: f32[1,256], index: 8, kind: input, shape index: {}]   ;;  %s4224_s9 = inlined_call_operand.hbm [shape: f32[64,256], index: 9, kind: output, shape index: {}]  }
   0x1   :  { %4228 = sst [smem:[#allocation20_spill]] %s4216_s1 }
   0x2   :  { %4229 = sst [smem:[#allocation21_spill]] %s4217_s2 }
   0x3   :  { %4230 = sst [smem:[#allocation22_spill]] %s4218_s3 }
   0x4   :  { %4231 = sst [smem:[#allocation23_spill]] %s4224_s9 }
   0x5   :  { %14 = vsyncpa [#allocation3], 0 }
   0x6   :  { %16 = vsyncpa [#allocation3 + $0x1], 0 }
   0x7   :  { %17 = vsyncpa [#allocation6], 0 }
   0x8   :  { %18 = vsyncpa [#allocation9], 0 }
   0x9   :  { %19 = vsyncpa [#allocation12], 0 }
   0xa   :  { %20 = vsyncpa [#allocation4], 0 }
   0xb   :  { %22 = vsyncpa [#allocation4 + $0x1], 0  ;;  %s3940_s30 = smov 0   ;;  %s3942_s10 = smov 0  }
   0xc   :  { %s3944_s11 = smov 0   ;;  %s3946_s12 = smov 0  }
   0xd LB: > { %s4232_s1 = sld [smem:[#allocation20_spill]]  ;;  %s3964_s16 = sadd.s32 4294967295, %s3874_s12   ;;  %s3874_s12 = sphi %s3946_s12, %s4249_s12   ;;  %s3870_s11 = sphi %s3944_s11, %s4248_s11   ;;  %s3866_s10 = sphi %s3942_s10, %s4247_s10   ;;  %s3862_s30 = sphi %s3940_s30, %s4246_s30  }
   0xe   : > { %p2427_p0 = scmp.ge.s32.totalorder %s3874_s12, 1  ;;  %p49_p1 = scmp.eq.s32.totalorder %s3964_s16, 0 }
   0xf   : > { %p253_p2 = scmp.lt.s32.totalorder %s3874_s12, 3  ;;  %s3876_s18 = smov [#allocation5]  }
  0x10   : > { %s266_s19 = sshll.u32 %s3876_s18, 4  ;;  %s4234_s3 = sld [smem:[#allocation22_spill]]  ;;  %s267_s19 = int_to_ptr.vmem [resolvable:$true] %s266_s19 }
  0x11   : > { %p3969_p3 = pnand %p2427_p0, %p253_p2  ;;  %s3877_s24 = smov [#allocation8]  }
  0x12   : > { %s292_s25 = sshll.u32 %s3877_s24, 4  ;;  %s3878_s26 = smov 256   ;;  %s293_s25 = int_to_ptr.vmem [resolvable:$true] %s292_s25 }
  0x13   : > { %s264_s15 = sshll.u32 %s4232_s1, 4  ;;  %p3466_p4 = pneg %p3969_p3  ;;  %s265_s15 = int_to_ptr.hbm [resolvable:$true] %s264_s15 }
  0x14   : > { %s3879_s27 = smov 16   ;;  %s3880_s28 = smov 64  }
  0x15   : > { %p3981_p6 = pnand %p3466_p4, %p49_p1  ;;  %s3881_s29 = smov 4  }
  0x16   : > { %s290_s22 = sshll.u32 %s4234_s3, 4  ;;  %s316_s18 = sshll.u32 %s4220_s5, 4  ;;  %s291_s22 = int_to_ptr.hbm [resolvable:$true] %s290_s22  ;;  %s317_s18 = int_to_ptr.hbm [resolvable:$true] %s316_s18 }
  0x17   : > { %3469 = dma.hbm_to_vmem [thread:$0]  (!%p3981_p6), %s265_s15, 8192, %s267_s19, [#allocation6], %s3878_s26, %s3878_s26, %s3879_s27  }
  0x18   : > { %3475 = dma.hbm_to_vmem [thread:$0]  (!%p3981_p6), %s291_s22, 4096, %s293_s25, [#allocation9], %s3880_s28, %s3880_s28, %s3881_s29  }
  0x19   : > { %s3882_s20 = smov [#allocation11]   ;;  %s4236_s2 = sld [smem:[#allocation21_spill]] }
  0x1a   : > { %s318_s21 = sshll.u32 %s3882_s20, 4  ;;  %s3883_s15 = smov [#allocation7]   ;;  %s319_s21 = int_to_ptr.vmem [resolvable:$true] %s318_s21 }
  0x1b   : > { %3481 = dma.hbm_to_vmem [thread:$0]  (!%p3981_p6), %s317_s18, 4096, %s319_s21, [#allocation12], %s3878_s26, %s3878_s26, %s3879_s27  }
  0x1c   : > { %s281_s19 = sshll.u32 %s3883_s15, 4  ;;  %s305_s25 = sshll.u32 %s4219_s4, 4  ;;  %s282_s19 = int_to_ptr.vmem [resolvable:$true] %s281_s19  ;;  %s306_s25 = int_to_ptr.hbm [resolvable:$true] %s305_s25 }
  0x1d   : > { %s333_s26 = sshll.u32 %s4222_s7, 4  ;;  %s3884_s27 = smov [#allocation10]   ;;  %s334_s26 = int_to_ptr.hbm [resolvable:$true] %s333_s26 }
  0x1e   : > { %s307_s29 = sshll.u32 %s3884_s27, 4  ;;  %s3885_s9 = smov [#allocation13]   ;;  %s308_s29 = int_to_ptr.vmem [resolvable:$true] %s307_s29 }
  0x1f   : > { %s279_s3 = sshll.u32 %s4236_s2, 4  ;;  %s4226_s13 = smov 128   ;;  %s280_s3 = int_to_ptr.hbm [resolvable:$true] %s279_s3 }
  0x20   : > { %3472 = dma.hbm_to_vmem [thread:$0]  (!%p3981_p6), %s280_s3, 64, %s282_s19, [#allocation6]  }
  0x21   : > { %3478 = dma.hbm_to_vmem [thread:$0]  (!%p3981_p6), %s306_s25, 16, %s308_s29, [#allocation9]  }
  0x22   : > { %s335_s3 = sshll.u32 %s3885_s9, 4  ;;  %s4227_s14 = smov 8   ;;  %s336_s3 = int_to_ptr.vmem [resolvable:$true] %s335_s3 }
  0x23   : > { %3484 = dma.hbm_to_vmem [thread:$0]  (!%p3981_p6), %s334_s26, 8192, %s336_s3, [#allocation12], %s4226_s13, %s4226_s13, %s4227_s14  }
  0x24   : > { %s2426_s18 = sadd.s32 4294967294, %s3874_s12   ;;  %s4014_s20 = sadd.s32 1, %s3874_s12  }
  0x25   : > { %s32_s21 = ssub.s32 %s3874_s12, %s4014_s20  ;;  %s35_s24 = sadd.s32 1, %s3870_s11 }
  0x26   : > { %p33_p7 = scmp.eq.s32.totalorder %s32_s21, 0  ;;  %p42_p8 = scmp.ne.s32.totalorder %s3870_s11, %s3866_s10 }
  0x27   : > { %p43_p9 = scmp.eq.s32.totalorder %s3874_s12, 0  ;;  %p48_p10 = scmp.ne.s32.totalorder %s3866_s10, %s3862_s30 }
  0x28   : > { %s4025_s15 = scalar_select %p33_p7, %s3870_s11, %s35_s24  }
  0x29   : > { %p4027_p11 = por %p43_p9, %p42_p8  ;;  %p4033_p12 = por %p49_p1, %p48_p10 }
  0x2a   : > { %p240_p13 = scmp.eq.s32.totalorder %s3964_s16, 1  ;;  %p246_p0 = scmp.eq.s32.totalorder %s2426_s18, 1 }
  0x2b   : > { %p3499_p2 = scmp.lt.s32.totalorder %s3874_s12, 2  ;;  %s352_s22 = sand.u32 1, %s3870_s11  }
  0x2c   : > { %p4040_p4 = por %p240_p13, %p42_p8  ;;  %p4044_p6 = por %p246_p0, %p48_p10 }
  0x2d   : > { %s2435_s1 = sshll.u32 %s352_s22, 5  ;;  %s3239_s26 = sshll.u32 %s3874_s12, 5 }
  0x2e   : > { %s362_s9 = scalar_lea.hbm %s4215_s0, %s3239_s26  ;;  %s356_s3 = scalar_lea.vmem [#allocation2], %s2435_s1 }
  0x2f   : > { %s365_s21 = sshll.u32 %s356_s3, 4  ;;  %s363_s24 = sshll.u32 %s362_s9, 4  ;;  %s366_s21 = int_to_ptr.vmem [resolvable:$true] %s365_s21  ;;  %s364_s24 = int_to_ptr.hbm [resolvable:$true] %s363_s24 }
  0x30   : > { %p4054_p7 = pnand %p3499_p2, %p4027_p11  ;;  %s353_s13 = scalar_lea.sflag [#allocation3], %s352_s22 }
  0x31   : > { %s3766_s14 = sshra.s32 %s364_s24, 4  ;;  %s3773_s27 = scalar_lea.hbm %s4215_s0, 64  ;;  %s3767_s14 = int_to_ptr.hbm [resolvable:$true] %s3766_s14 }
  0x32   : > { %s3768_s2 = scalar_lea.hbm %s3767_s14, 32  ;;  %p3770_p9 = pneg %p4054_p7 }
  0x33   : > { %p3769_p8 = scmp.ne.s32.totalorder %s3767_s14, %s3768_s2  ;;  %p3774_p11 = scmp.lt.s32.totalorder %s3767_s14, %s4215_s0 }
  0x34   : > { %p3775_p0 = scmp.lt.s32.totalorder %s3773_s27, %s3768_s2 }
  0x35   : > { %p3771_p10 = pnand %p3770_p9, %p3769_p8 }
  0x36   : > { %p3776_p2 = por %p3775_p0, %p3774_p11 }
  0x37   : > { %p3772_p13 = pneg %p3771_p10 }
  0x39   : > { %p3777_p5 = pnand %p3776_p2, %p3772_p13 }
  0x3b   : > { %3780 = shalt.err (!%p3777_p5)
}
  0x3c   : > { %s4242_s22 = smov 8   ;;  %s4243_s9 = smov 128  }
  0x3d   : > { %3488 = dma.hbm_to_vmem [thread:$0]  (!%p4054_p7), %s364_s24, 512, %s366_s21, %s353_s13, %s4243_s9, %s4243_s9, %s4242_s22  }
  0x3e   : > { %377 = sbr.rel (%p3969_p3) target bundleno = 799 (0x31f), region = 56  ;;  %s4074_s3 = sand.u32 (!%p3969_p3), 1, %s3866_s10  }
  0x3f   : > { %s2440_s14 = sshll.u32 (!%p3969_p3), %s4074_s3, 5  ;;  %s380_s2 = scalar_lea.sflag (!%p3969_p3), [#allocation3], %s4074_s3 }
  0x40   : > { %s4078_s1 = scalar_lea.vmem (!%p3969_p3), [#allocation2], %s2440_s14 }
  0x43   : > { %3841 = dma.done.wait (%p4033_p12), %s380_s2, 512  }
  0x44   : > { %3843 = vsyncadd (%p4033_p12), %s380_s2, 4294966784 }
  0x45   : > { %3845 = dma.done.wait (%p49_p1), [#allocation6], 8256  }
  0x46   : > { %3847 = vsyncadd (%p49_p1), [#allocation6], 4294959040 }
  0x47   : > { %3849 = dma.done.wait (%p49_p1), [#allocation9], 4112  }
  0x48   : > { %3851 = vsyncadd (%p49_p1), [#allocation9], 4294963184 }
  0x49   : > { %3853 = dma.done.wait (%p49_p1), [#allocation12], 12288  }
  0x4a   : > { %3855 = vsyncadd (%p49_p1), [#allocation12], 4294955008  ;;  %v2578_v0 = vld [vmem:[#allocation5 + $0xe0] sm:$0xf]  ;;  %v3274_v1 = vld [vmem:[#allocation5 + $0xec] sm:$0xf0] }
  0x4b   : > { %v2706_v2 = vld [vmem:[#allocation5 + $0x1e0] sm:$0xf]  ;;  %v2579_v3 = vor.u32 %v3274_v1, %v2578_v0  ;;  %v3306_v4 = vld [vmem:[#allocation5 + $0x1ec] sm:$0xf0]  ;;  %v3272_v5 = vld [vmem:[#allocation5 + $0xe4] sm:$0xf] }
  0x4c   : > { %v2580_v6 = vld [vmem:[#allocation5 + $0xf0] sm:$0xf0]  ;;  %v2707_v7 = vor.u32 %v3306_v4, %v2706_v2  ;;  %v3304_v9 = vld [vmem:[#allocation5 + $0x1e4] sm:$0xf]  ;;  %v2562_v11 = vld [vmem:[#allocation5 + $0xc0] sm:$0xf] }
  0x4d   : > { %v2583_v8 = vor.u32 %v3272_v5, %v2580_v6  ;;  %v2708_v10 = vld [vmem:[#allocation5 + $0x1f0] sm:$0xf0]  ;;  %869 = vmatpush.bf16.msra.mxu0 %v2579_v3  ;;  %v3270_v13 = vld [vmem:[#allocation5 + $0xcc] sm:$0xf0]  ;;  %v2690_v14 = vld [vmem:[#allocation5 + $0x1c0] sm:$0xf] }
  0x4e   : > { %v2711_v12 = vor.u32 %v3304_v9, %v2708_v10  ;;  %v3302_v15 = vld [vmem:[#allocation5 + $0x1cc] sm:$0xf0]  ;;  %888 = vmatpush.bf16.msra.mxu1 %v2707_v7  ;;  %v2563_v16 = vor.u32 %v3270_v13, %v2562_v11  ;;  %v3268_v18 = vld [vmem:[#allocation5 + $0xc4] sm:$0xf]  ;;  %v2564_v19 = vld [vmem:[#allocation5 + $0xd0] sm:$0xf0] }
  0x4f   : > { %907 = vmatpush.bf16.msra.mxu2 %v2583_v8  ;;  %v2691_v17 = vor.u32 %v3302_v15, %v2690_v14  ;;  %v3300_v20 = vld [vmem:[#allocation5 + $0x1c4] sm:$0xf]  ;;  %v2567_v21 = vor.u32 %v3268_v18, %v2564_v19  ;;  %v2692_v22 = vld [vmem:[#allocation5 + $0x1d0] sm:$0xf0]  ;;  %v2546_v23 = vld [vmem:[#allocation5 + $0xa0] sm:$0xf] }
  0x50   : > { %926 = vmatpush.bf16.msra.mxu3 %v2711_v12  ;;  %v3266_v24 = vld [vmem:[#allocation5 + $0xac] sm:$0xf0]  ;;  %v2695_v25 = vor.u32 %v3300_v20, %v2692_v22  ;;  %v2674_v26 = vld [vmem:[#allocation5 + $0x1a0] sm:$0xf]  ;;  %v3264_v28 = vld [vmem:[#allocation5 + $0xa4] sm:$0xf] }
  0x51   : > { %v3298_v27 = vld [vmem:[#allocation5 + $0x1ac] sm:$0xf0]  ;;  %870 = vmatpush.bf16.msra.mxu0 %v2563_v16  ;;  %v2547_v29 = vor.u32 %v3266_v24, %v2546_v23  ;;  %v2548_v30 = vld [vmem:[#allocation5 + $0xb0] sm:$0xf0]  ;;  %v3296_v31 = vld [vmem:[#allocation5 + $0x1a4] sm:$0xf] }
  0x52   : > { %v2676_v32 = vld [vmem:[#allocation5 + $0x1b0] sm:$0xf0]  ;;  %889 = vmatpush.bf16.msra.mxu1 %v2691_v17  ;;  %v2675_v33 = vor.u32 %v3298_v27, %v2674_v26  ;;  %v2551_v34 = vor.u32 %v3264_v28, %v2548_v30  ;;  %v2530_v35 = vld [vmem:[#allocation5 + $0x80] sm:$0xf]  ;;  %v3262_v36 = vld [vmem:[#allocation5 + $0x8c] sm:$0xf0] }
  0x53   : > { %908 = vmatpush.bf16.msra.mxu2 %v2567_v21  ;;  %v2658_v37 = vld [vmem:[#allocation5 + $0x180] sm:$0xf]  ;;  %v2679_v38 = vor.u32 %v3296_v31, %v2676_v32  ;;  %v3294_v39 = vld [vmem:[#allocation5 + $0x18c] sm:$0xf0]  ;;  %v3260_v40 = vld [vmem:[#allocation5 + $0x84] sm:$0xf]  ;;  %v2531_v44 = vor.u32 %v3262_v36, %v2530_v35 }
  0x54   : > { %927 = vmatpush.bf16.msra.mxu3 %v2695_v25  ;;  %v2532_v41 = vld [vmem:[#allocation5 + $0x90] sm:$0xf0]  ;;  %v3292_v42 = vld [vmem:[#allocation5 + $0x184] sm:$0xf]  ;;  %v2659_v45 = vor.u32 %v3294_v39, %v2658_v37  ;;  %v2514_v47 = vld [vmem:[#allocation5 + $0x60] sm:$0xf] }
  0x55   : > { %v2660_v43 = vld [vmem:[#allocation5 + $0x190] sm:$0xf0]  ;;  %871 = vmatpush.bf16.msra.mxu0 %v2547_v29  ;;  %v2535_v46 = vor.u32 %v3260_v40, %v2532_v41  ;;  %v3258_v48 = vld [vmem:[#allocation5 + $0x6c] sm:$0xf0]  ;;  %v2642_v49 = vld [vmem:[#allocation5 + $0x160] sm:$0xf] }
  0x56   : > { %890 = vmatpush.bf16.msra.mxu1 %v2675_v33  ;;  %v2663_v50 = vor.u32 %v3292_v42, %v2660_v43  ;;  %v3290_v51 = vld [vmem:[#allocation5 + $0x16c] sm:$0xf0]  ;;  %v3256_v52 = vld [vmem:[#allocation5 + $0x64] sm:$0xf]  ;;  %v2516_v53 = vld [vmem:[#allocation5 + $0x70] sm:$0xf0]  ;;  %v2515_v56 = vor.u32 %v3258_v48, %v2514_v47 }
  0x57   : > { %909 = vmatpush.bf16.msra.mxu2 %v2551_v34  ;;  %v3288_v54 = vld [vmem:[#allocation5 + $0x164] sm:$0xf]  ;;  %v2644_v55 = vld [vmem:[#allocation5 + $0x170] sm:$0xf0]  ;;  %v2643_v57 = vor.u32 %v3290_v51, %v2642_v49  ;;  %v2519_v58 = vor.u32 %v3256_v52, %v2516_v53  ;;  %v2498_v59 = vld [vmem:[#allocation5 + $0x40] sm:$0xf] }
  0x58   : > { %928 = vmatpush.bf16.msra.mxu3 %v2679_v38  ;;  %v3254_v60 = vld [vmem:[#allocation5 + $0x4c] sm:$0xf0]  ;;  %v2626_v61 = vld [vmem:[#allocation5 + $0x140] sm:$0xf]  ;;  %v2647_v62 = vor.u32 %v3288_v54, %v2644_v55  ;;  %v3252_v0 = vld [vmem:[#allocation5 + $0x44] sm:$0xf] }
  0x59   : > { %872 = vmatpush.bf16.msra.mxu0 %v2531_v44  ;;  %v3286_v63 = vld [vmem:[#allocation5 + $0x14c] sm:$0xf0]  ;;  %v2500_v1 = vld [vmem:[#allocation5 + $0x50] sm:$0xf0]  ;;  %v3284_v2 = vld [vmem:[#allocation5 + $0x144] sm:$0xf]  ;;  %v2499_v4 = vor.u32 %v3254_v60, %v2498_v59 }
  0x5a   : > { %891 = vmatpush.bf16.msra.mxu1 %v2659_v45  ;;  %v2628_v3 = vld [vmem:[#allocation5 + $0x150] sm:$0xf0]  ;;  %v2627_v5 = vor.u32 %v3286_v63, %v2626_v61  ;;  %v2503_v6 = vor.u32 %v3252_v0, %v2500_v1  ;;  %v2482_v7 = vld [vmem:[#allocation5 + $0x20] sm:$0xf]  ;;  %v3250_v8 = vld [vmem:[#allocation5 + $0x2c] sm:$0xf0] }
  0x5b   : > { %910 = vmatpush.bf16.msra.mxu2 %v2535_v46  ;;  %v2610_v9 = vld [vmem:[#allocation5 + $0x120] sm:$0xf]  ;;  %v2631_v10 = vor.u32 %v3284_v2, %v2628_v3  ;;  %v3282_v11 = vld [vmem:[#allocation5 + $0x12c] sm:$0xf0]  ;;  %v3248_v12 = vld [vmem:[#allocation5 + $0x24] sm:$0xf]  ;;  %v2483_v16 = vor.u32 %v3250_v8, %v2482_v7 }
  0x5c   : > { %929 = vmatpush.bf16.msra.mxu3 %v2663_v50  ;;  %v2484_v13 = vld [vmem:[#allocation5 + $0x30] sm:$0xf0]  ;;  %v3280_v14 = vld [vmem:[#allocation5 + $0x124] sm:$0xf]  ;;  %v2466_v17 = vld [vmem:[#allocation5] sm:$0xf]  ;;  %v2611_v19 = vor.u32 %v3282_v11, %v2610_v9 }
  0x5d   : > { %873 = vmatpush.bf16.msra.mxu0 %v2515_v56  ;;  %v2612_v15 = vld [vmem:[#allocation5 + $0x130] sm:$0xf0]  ;;  %v3246_v18 = vld [vmem:[#allocation5 + $0xc] sm:$0xf0]  ;;  %v2487_v20 = vor.u32 %v3248_v12, %v2484_v13  ;;  %v2594_v21 = vld [vmem:[#allocation5 + $0x100] sm:$0xf] }
  0x5e   : > { %892 = vmatpush.bf16.msra.mxu1 %v2643_v57  ;;  %v3278_v22 = vld [vmem:[#allocation5 + $0x10c] sm:$0xf0]  ;;  %v3244_v23 = vld [vmem:[#allocation5 + $0x4] sm:$0xf]  ;;  %v2615_v24 = vor.u32 %v3280_v14, %v2612_v15  ;;  %v2468_v25 = vld [vmem:[#allocation5 + $0x10] sm:$0xf0]  ;;  %v2467_v31 = vor.u32 %v3246_v18, %v2466_v17 }
  0x5f   : > { %911 = vmatpush.bf16.msra.mxu2 %v2519_v58  ;;  %v3276_v26 = vld [vmem:[#allocation5 + $0x104] sm:$0xf]  ;;  %v2596_v27 = vld [vmem:[#allocation5 + $0x110] sm:$0xf0]  ;;  %v2450_v28 = vld [vmem:[%s4078_s1] sm:$0xf]  ;;  %v2595_v35 = vor.u32 %v3278_v22, %v2594_v21  ;;  %v2471_v36 = vor.u32 %v3244_v23, %v2468_v25 }
  0x60   : > { %930 = vmatpush.bf16.msra.mxu3 %v2647_v62  ;;  %v3273_v29 = vld [vmem:[#allocation5 + $0xec] sm:$0xf]  ;;  %v2588_v30 = vld [vmem:[#allocation5 + $0xf8] sm:$0xf0]  ;;  %v3241_v32 = vld [vmem:[%s4078_s1 + $0x4] sm:$0xf0]  ;;  %v2599_v39 = vor.u32 %v3276_v26, %v2596_v27 }
  0x61   : > { %874 = vmatpush.bf16.msra.mxu0 %v2499_v4  ;;  %v2714_v33 = vld [vmem:[#allocation5 + $0x1e8] sm:$0xf]  ;;  %v3307_v34 = vld [vmem:[#allocation5 + $0x1f4] sm:$0xf0]  ;;  %v3240_v37 = vld [vmem:[%s4078_s1 + $0x4] sm:$0xf]  ;;  %v2591_v40 = vor.u32 %v3273_v29, %v2588_v30  ;;  %v4100_v44 = vor.u32 %v3241_v32, %v2450_v28 }
  0x62   : > { %893 = vmatpush.bf16.msra.mxu1 %v2627_v5  ;;  %v2452_v38 = vld [vmem:[%s4078_s1 + $0x8] sm:$0xf0]  ;;  %v2586_v41 = vld [vmem:[#allocation5 + $0xe8] sm:$0xf]  ;;  %v3275_v42 = vld [vmem:[#allocation5 + $0xf4] sm:$0xf0]  ;;  %v2715_v45 = vor.u32 %v3307_v34, %v2714_v33 }
  0x63   : > { %912 = vmatpush.bf16.msra.mxu2 %v2503_v6  ;;  %v3305_v43 = vld [vmem:[#allocation5 + $0x1ec] sm:$0xf]  ;;  %v2716_v46 = vld [vmem:[#allocation5 + $0x1f8] sm:$0xf0]  ;;  %v4102_v49 = vor.u32 %v3240_v37, %v2452_v38  ;;  %v2698_v50 = vld [vmem:[#allocation5 + $0x1c8] sm:$0xf]  ;;  %v2587_v52 = vor.u32 %v3275_v42, %v2586_v41 }
  0x64   : > { %931 = vmatpush.bf16.msra.mxu3 %v2631_v10  ;;  %v3269_v47 = vld [vmem:[#allocation5 + $0xcc] sm:$0xf]  ;;  %v2572_v48 = vld [vmem:[#allocation5 + $0xd8] sm:$0xf0]  ;;  %v3303_v51 = vld [vmem:[#allocation5 + $0x1d4] sm:$0xf0]  ;;  %v2719_v53 = vor.u32 %v3305_v43, %v2716_v46 }
  0x65   : > { %875 = vmatpush.bf16.msra.mxu0 %v2483_v16  ;;  %v2575_v54 = vor.u32 %v3269_v47, %v2572_v48  ;;  %v2570_v55 = vld [vmem:[#allocation5 + $0xc8] sm:$0xf]  ;;  %v3271_v56 = vld [vmem:[#allocation5 + $0xd4] sm:$0xf0]  ;;  %v3301_v57 = vld [vmem:[#allocation5 + $0x1cc] sm:$0xf]  ;;  %v2699_v58 = vor.u32 %v3303_v51, %v2698_v50 }
  0x66   : > { %894 = vmatpush.bf16.msra.mxu1 %v2611_v19  ;;  %v2700_v59 = vld [vmem:[#allocation5 + $0x1d8] sm:$0xf0]  ;;  %v3265_v60 = vld [vmem:[#allocation5 + $0xac] sm:$0xf]  ;;  %v2682_v62 = vld [vmem:[#allocation5 + $0x1a8] sm:$0xf]  ;;  %v2571_v0 = vor.u32 %v3271_v56, %v2570_v55 }
  0x67   : > { %913 = vmatpush.bf16.msra.mxu2 %v2487_v20  ;;  %v2556_v61 = vld [vmem:[#allocation5 + $0xb8] sm:$0xf0]  ;;  %v3299_v63 = vld [vmem:[#allocation5 + $0x1b4] sm:$0xf0]  ;;  %v2703_v1 = vor.u32 %v3301_v57, %v2700_v59  ;;  %v2554_v3 = vld [vmem:[#allocation5 + $0xa8] sm:$0xf] }
  0x68   : > { %932 = vmatpush.bf16.msra.mxu3 %v2615_v24  ;;  %v2559_v2 = vor.u32 %v3265_v60, %v2556_v61  ;;  %v3267_v4 = vld [vmem:[#allocation5 + $0xb4] sm:$0xf0]  ;;  %v3297_v5 = vld [vmem:[#allocation5 + $0x1ac] sm:$0xf]  ;;  %v2683_v6 = vor.u32 %v3299_v63, %v2682_v62  ;;  %v2684_v7 = vld [vmem:[#allocation5 + $0x1b8] sm:$0xf0] }
  0x69   : > { %876 = vmatpush.bf16.msra.mxu0 %v2467_v31  ;;  %v3261_v8 = vld [vmem:[#allocation5 + $0x8c] sm:$0xf]  ;;  %v2540_v9 = vld [vmem:[#allocation5 + $0x98] sm:$0xf0]  ;;  %v2666_v10 = vld [vmem:[#allocation5 + $0x188] sm:$0xf]  ;;  %v2555_v12 = vor.u32 %v3267_v4, %v2554_v3  ;;  %v2687_v14 = vor.u32 %v3297_v5, %v2684_v7 }
  0x6a   : > { %895 = vmatpush.bf16.msra.mxu1 %v2595_v35  ;;  %v3295_v11 = vld [vmem:[#allocation5 + $0x194] sm:$0xf0]  ;;  %v2538_v13 = vld [vmem:[#allocation5 + $0x88] sm:$0xf]  ;;  %v2543_v15 = vor.u32 %v3261_v8, %v2540_v9  ;;  %v3293_v17 = vld [vmem:[#allocation5 + $0x18c] sm:$0xf] }
  0x6b   : > { %914 = vmatpush.bf16.msra.mxu2 %v2471_v36  ;;  %v3263_v16 = vld [vmem:[#allocation5 + $0x94] sm:$0xf0]  ;;  %v2668_v18 = vld [vmem:[#allocation5 + $0x198] sm:$0xf0]  ;;  %v2667_v19 = vor.u32 %v3295_v11, %v2666_v10  ;;  %v2458_v20 = vld [vmem:[%s4078_s1 + $0x10] sm:$0xf] }
  0x6c   : > { %933 = vmatpush.bf16.msra.mxu3 %v2599_v39  ;;  %877 = vmatmul.bf16.vlgmr.msra.gmra.mxu0 %v4100_v44  ;;  %v3257_v21 = vld [vmem:[#allocation5 + $0x6c] sm:$0xf]  ;;  %v2524_v22 = vld [vmem:[#allocation5 + $0x78] sm:$0xf0]  ;;  %v3243_v23 = vld [vmem:[%s4078_s1 + $0x14] sm:$0xf0]  ;;  %v2539_v26 = vor.u32 %v3263_v16, %v2538_v13  ;;  %v2671_v30 = vor.u32 %v3293_v17, %v2668_v18 }
  0x6d   : > { %896 = vmatmul.bf16.vlgmr.msra.gmra.mxu1 %v4102_v49  ;;  %945 = vmatpush.bf16.msrb.mxu0 %v2587_v52  ;;  %v2650_v24 = vld [vmem:[#allocation5 + $0x168] sm:$0xf]  ;;  %v3291_v25 = vld [vmem:[#allocation5 + $0x174] sm:$0xf0]  ;;  %v3242_v27 = vld [vmem:[%s4078_s1 + $0x14] sm:$0xf]  ;;  %v2527_v31 = vor.u32 %v3257_v21, %v2524_v22  ;;  %v4112_v34 = vor.u32 %v3243_v23, %v2458_v20 }
  0x6e   : > { %964 = vmatpush.bf16.msrb.mxu1 %v2715_v45  ;;  %915 = vmatmul.bf16.vlgmr.msra.gmra.mxu2 %v4100_v44  ;;  %v2460_v28 = vld [vmem:[%s4078_s1 + $0x18] sm:$0xf0]  ;;  %v2522_v29 = vld [vmem:[#allocation5 + $0x68] sm:$0xf]  ;;  %v3259_v32 = vld [vmem:[#allocation5 + $0x74] sm:$0xf0]  ;;  %v2651_v35 = vor.u32 %v3291_v25, %v2650_v24 }
  0x6f   : > { %983 = vmatpush.bf16.msrb.mxu2 %v2591_v40  ;;  %934 = vmatmul.bf16.vlgmr.msra.gmra.mxu3 %v4102_v49  ;;  %v3289_v33 = vld [vmem:[#allocation5 + $0x16c] sm:$0xf]  ;;  %v2652_v36 = vld [vmem:[#allocation5 + $0x178] sm:$0xf0]  ;;  %v4114_v39 = vor.u32 %v3242_v27, %v2460_v28  ;;  %v2634_v40 = vld [vmem:[#allocation5 + $0x148] sm:$0xf]  ;;  %v2523_v42 = vor.u32 %v3259_v32, %v2522_v29 }
  0x70   : > { %1002 = vmatpush.bf16.msrb.mxu3 %v2719_v53  ;;  %v3253_v37 = vld [vmem:[#allocation5 + $0x4c] sm:$0xf]  ;;  %v2508_v38 = vld [vmem:[#allocation5 + $0x58] sm:$0xf0]  ;;  %v3287_v41 = vld [vmem:[#allocation5 + $0x154] sm:$0xf0]  ;;  %v2655_v43 = vor.u32 %v3289_v33, %v2652_v36 }
  0x71   : > { %946 = vmatpush.bf16.msrb.mxu0 %v2571_v0  ;;  %v2511_v45 = vor.u32 %v3253_v37, %v2508_v38  ;;  %v2506_v46 = vld [vmem:[#allocation5 + $0x48] sm:$0xf]  ;;  %v3255_v47 = vld [vmem:[#allocation5 + $0x54] sm:$0xf0]  ;;  %v3285_v48 = vld [vmem:[#allocation5 + $0x14c] sm:$0xf]  ;;  %v2635_v50 = vor.u32 %v3287_v41, %v2634_v40 }
  0x72   : > { %965 = vmatpush.bf16.msrb.mxu1 %v2699_v58  ;;  %v2636_v51 = vld [vmem:[#allocation5 + $0x158] sm:$0xf0]  ;;  %v3249_v52 = vld [vmem:[#allocation5 + $0x2c] sm:$0xf]  ;;  %v3283_v55 = vld [vmem:[#allocation5 + $0x134] sm:$0xf0]  ;;  %v2507_v56 = vor.u32 %v3255_v47, %v2506_v46 }
  0x73   : > { %984 = vmatpush.bf16.msrb.mxu2 %v2575_v54  ;;  %v2492_v53 = vld [vmem:[#allocation5 + $0x38] sm:$0xf0]  ;;  %v2618_v54 = vld [vmem:[#allocation5 + $0x128] sm:$0xf]  ;;  %v2639_v57 = vor.u32 %v3285_v48, %v2636_v51  ;;  %v3251_v60 = vld [vmem:[#allocation5 + $0x34] sm:$0xf0] }
  0x74   : > { %1003 = vmatpush.bf16.msrb.mxu3 %v2703_v1  ;;  %v2495_v58 = vor.u32 %v3249_v52, %v2492_v53  ;;  %v2490_v59 = vld [vmem:[#allocation5 + $0x28] sm:$0xf]  ;;  %v3281_v61 = vld [vmem:[#allocation5 + $0x12c] sm:$0xf]  ;;  %v2619_v62 = vor.u32 %v3283_v55, %v2618_v54  ;;  %v2620_v63 = vld [vmem:[#allocation5 + $0x138] sm:$0xf0] }
  0x75   : > { %947 = vmatpush.bf16.msrb.mxu0 %v2555_v12  ;;  %v3245_v0 = vld [vmem:[#allocation5 + $0xc] sm:$0xf]  ;;  %v2476_v1 = vld [vmem:[#allocation5 + $0x18] sm:$0xf0]  ;;  %v3279_v3 = vld [vmem:[#allocation5 + $0x114] sm:$0xf0]  ;;  %v2491_v4 = vor.u32 %v3251_v60, %v2490_v59  ;;  %v2623_v5 = vor.u32 %v3281_v61, %v2620_v63 }
  0x76   : > { %966 = vmatpush.bf16.msrb.mxu1 %v2683_v6  ;;  %v2479_v6 = vor.u32 %v3245_v0, %v2476_v1  ;;  %v2474_v7 = vld [vmem:[#allocation5 + $0x8] sm:$0xf]  ;;  %v3247_v8 = vld [vmem:[#allocation5 + $0x14] sm:$0xf0]  ;;  %v3277_v10 = vld [vmem:[#allocation5 + $0x10c] sm:$0xf] }
  0x77   : > { %985 = vmatpush.bf16.msrb.mxu2 %v2559_v2  ;;  %v2602_v2 = vld [vmem:[#allocation5 + $0x108] sm:$0xf]  ;;  %v2604_v11 = vld [vmem:[#allocation5 + $0x118] sm:$0xf0]  ;;  %v2475_v13 = vor.u32 %v3247_v8, %v2474_v7  ;;  %v3314_v16 = vld [vmem:[#allocation8 + $0x30] sm:$0xff]  ;;  %s2447_s24 = sshll.u32 %s4074_s3, 6 }
  0x78   : > { %1004 = vmatpush.bf16.msrb.mxu3 %v2687_v14  ;;  %v2603_v9 = vor.u32 %v3279_v3, %v2602_v2  ;;  %v3323_v12 = vld [vmem:[#allocation8 + $0x78] sm:$0xff]  ;;  %v2607_v14 = vor.u32 %v3277_v10, %v2604_v11  ;;  %v3322_v17 = vld [vmem:[#allocation8 + $0x70] sm:$0xff]  ;;  %v3313_v18 = vld [vmem:[#allocation8 + $0x28] sm:$0xff]  ;;  %s4171_s18 = scalar_lea.vmem [#allocation14], %s2447_s24  ;;  %s3437_s26 = sshll.u32 %s3964_s16, 6 }
  0x79   : > { %948 = vmatpush.bf16.msrb.mxu0 %v2539_v26  ;;  %v3321_v20 = vld [vmem:[#allocation8 + $0x68] sm:$0xff]  ;;  %v3311_v21 = vld [vmem:[#allocation8 + $0x18] sm:$0xff]  ;;  %v3318_v24 = vld [vmem:[#allocation8 + $0x50] sm:$0xff]  ;;  %s4244_s23 = sld [smem:[#allocation23_spill]]  ;;  %s2293_s9 = sshll.u32 %s4171_s18, 4  ;;  %s2294_s9 = int_to_ptr.vmem [resolvable:$true] %s2293_s9 }
  0x7a   : > { %967 = vmatpush.bf16.msrb.mxu1 %v2667_v19  ;;  %v3312_v19 = vld [vmem:[#allocation8 + $0x20] sm:$0xff]  ;;  %v3319_v22 = vld [vmem:[#allocation8 + $0x58] sm:$0xff]  ;;  %v3309_v23 = vld [vmem:[#allocation8 + $0x8] sm:$0xff]  ;;  %s2280_s2 = scalar_lea.sflag [#allocation4], %s4074_s3 }
  0x7b   : > { %986 = vmatpush.bf16.msrb.mxu2 %v2543_v15  ;;  %v3315_v15 = vld [vmem:[#allocation8 + $0x38] sm:$0xff]  ;;  %v3308_v25 = vld [vmem:[#allocation8] sm:$0xff]  ;;  %v3317_v26 = vld [vmem:[#allocation8 + $0x48] sm:$0xff] }
  0x7c   : > { %1005 = vmatpush.bf16.msrb.mxu3 %v2671_v30  ;;  %882 = vmatmul.bf16.gmra.mxu0 %v4112_v34  ;;  %v3331_v27 = vld [vmem:[#allocation8 + $0xb8] sm:$0xff]  ;;  %v3316_v28 = vld [vmem:[#allocation8 + $0x40] sm:$0xff]  ;;  %v3330_v29 = vld [vmem:[#allocation8 + $0xb0] sm:$0xff] }
  0x7d   : > { %901 = vmatmul.bf16.gmra.mxu1 %v4114_v39  ;;  %949 = vmatpush.bf16.msrb.mxu0 %v2523_v42  ;;  %v3339_v30 = vld [vmem:[#allocation8 + $0xf8] sm:$0xff]  ;;  %v3338_v32 = vld [vmem:[#allocation8 + $0xf0] sm:$0xff]  ;;  %v3337_v36 = vld [vmem:[#allocation8 + $0xe8] sm:$0xff] }
  0x7e   : > { %968 = vmatpush.bf16.msrb.mxu1 %v2651_v35  ;;  %920 = vmatmul.bf16.gmra.mxu2 %v4112_v34  ;;  %v4128_v33 = vld [vmem:[#allocation7] sm:$0xf]  ;;  %v3336_v40 = vld [vmem:[#allocation8 + $0xe0] sm:$0xff]  ;;  %v3326_v42 = vld [vmem:[#allocation8 + $0x90] sm:$0xff] }
  0x7f   : > { %987 = vmatpush.bf16.msrb.mxu2 %v2527_v31  ;;  %939 = vmatmul.bf16.gmra.mxu3 %v4114_v39  ;;  %v3329_v31 = vld [vmem:[#allocation8 + $0xa8] sm:$0xff]  ;;  %v521_v37 = vperm.slane %v4128_v33, 0  ;;  %v3335_v48 = vld [vmem:[#allocation8 + $0xd8] sm:$0xff]  ;;  %v3324_v59 = vld [vmem:[#allocation8 + $0x80] sm:$0xff]  ;;  %s2292_s22 = scalar_lea.hbm %s4244_s23, %s3437_s26  ;;  %s3816_s19 = scalar_lea.hbm %s4244_s23, 128 }
  0x80   : > { %1006 = vmatpush.bf16.msrb.mxu3 %v2655_v43  ;;  %v3325_v53 = vld [vmem:[#allocation8 + $0x88] sm:$0xff]  ;;  %v3332_v7 = vld [vmem:[#allocation8 + $0xc0] sm:$0xff]  ;;  %s2295_s14 = sshll.u32 %s2292_s22, 4  ;;  %s2296_s14 = int_to_ptr.hbm [resolvable:$true] %s2295_s14 }
  0x81   : > { %950 = vmatpush.bf16.msrb.mxu0 %v2507_v56  ;;  %v3334_v56 = vld [vmem:[#allocation8 + $0xd0] sm:$0xff]  ;;  %v3333_v2 = vld [vmem:[#allocation8 + $0xc8] sm:$0xff]  ;;  %s3810_s1 = sshra.s32 %s2296_s14, 4  ;;  %s3811_s1 = int_to_ptr.hbm [resolvable:$true] %s3810_s1 }
  0x82   : > { %969 = vmatpush.bf16.msrb.mxu1 %v2635_v50  ;;  %s3812_s16 = scalar_lea.hbm %s3811_s1, 64  ;;  %p3817_p12 = scmp.lt.s32.totalorder %s3811_s1, %s4244_s23 }
  0x83   : > { %988 = vmatpush.bf16.msrb.mxu2 %v2511_v45  ;;  %v522_v45 = vperm.slane %v4128_v33, 1  ;;  %p3813_p1 = scmp.ne.s32.totalorder %s3811_s1, %s3812_s16  ;;  %p3818_p7 = scmp.lt.s32.totalorder %s3816_s19, %s3812_s16 }
  0x84   : > { %1007 = vmatpush.bf16.msrb.mxu3 %v2639_v57 }
  0x85   : > { %951 = vmatpush.bf16.msrb.mxu0 %v2491_v4  ;;  %p3814_p3 = pnand %p3813_p1, %p4040_p4  ;;  %p3819_p8 = por %p3818_p7, %p3817_p12 }
  0x86   : > { %970 = vmatpush.bf16.msrb.mxu1 %v2619_v62 }
  0x87   : > { %989 = vmatpush.bf16.msrb.mxu2 %v2495_v58  ;;  %p3815_p5 = pneg %p3814_p3 }
  0x88   : > { %1008 = vmatpush.bf16.msrb.mxu3 %v2623_v5 }
  0x89   : > { %952 = vmatpush.bf16.msrb.mxu0 %v2475_v13  ;;  %p3820_p9 = pnand %p3819_p8, %p3815_p5 }
  0x8a   : > { %971 = vmatpush.bf16.msrb.mxu1 %v2603_v9 }
  0x8b   : > { %990 = vmatpush.bf16.msrb.mxu2 %v2479_v6 }
  0x8c   : > { %1009 = vmatpush.bf16.msrb.mxu3 %v2607_v14  ;;  %953 = vmatmul.bf16.vlgmr.msrb.gmra.mxu0 %v4100_v44 }
  0x8d   : > { %1305 = vmatpush.bf16.msra.mxu0 %v3315_v15  ;;  %972 = vmatmul.bf16.vlgmr.msrb.gmra.mxu1 %v4102_v49 }
  0x8e   : > { %1324 = vmatpush.bf16.msra.mxu1 %v3323_v12  ;;  %991 = vmatmul.bf16.vlgmr.msrb.gmra.mxu2 %v4100_v44  ;;  %v3320_v44 = vld [vmem:[#allocation8 + $0x60] sm:$0xff] }
  0x8f   : > { %1010 = vmatmul.bf16.vlgmr.msrb.gmra.mxu3 %v4102_v49  ;;  %v3310_v49 = vld [vmem:[#allocation8 + $0x10] sm:$0xff]  ;;  %1343 = vmatpush.bf16.msra.mxu2 %v3331_v27 }
  0x90   : > { %1362 = vmatpush.bf16.msra.mxu3 %v3339_v30 }
  0x91   : > { %1306 = vmatpush.bf16.msra.mxu0 %v3314_v16 }
  0x92   : > { %1325 = vmatpush.bf16.msra.mxu1 %v3322_v17 }
  0x93   : > { %1344 = vmatpush.bf16.msra.mxu2 %v3330_v29 }
  0x94   : > { %1363 = vmatpush.bf16.msra.mxu3 %v3338_v32 }
  0x95   : > { %1307 = vmatpush.bf16.msra.mxu0 %v3313_v18 }
  0x96   : > { %1326 = vmatpush.bf16.msra.mxu1 %v3321_v20 }
  0x97   : > { %1345 = vmatpush.bf16.msra.mxu2 %v3329_v31 }
  0x98   : > { %1364 = vmatpush.bf16.msra.mxu3 %v3337_v36 }
  0x99   : > { %1308 = vmatpush.bf16.msra.mxu0 %v3312_v19 }
  0x9a   : > { %1327 = vmatpush.bf16.msra.mxu1 %v3320_v44 }
  0x9c   : > { %958 = vmatmul.bf16.gmra.mxu0 %v4112_v34  ;;  %1365 = vmatpush.bf16.msra.mxu3 %v3336_v40 }
  0x9d   : > { %977 = vmatmul.bf16.gmra.mxu1 %v4114_v39  ;;  %1309 = vmatpush.bf16.msra.mxu0 %v3311_v21 }
  0x9e   : > { %996 = vmatmul.bf16.gmra.mxu2 %v4112_v34  ;;  %1328 = vmatpush.bf16.msra.mxu1 %v3319_v22  ;;  %v3328_v34 = vld [vmem:[#allocation8 + $0xa0] sm:$0xff] }
  0x9f   : > { %1015 = vmatmul.bf16.gmra.mxu3 %v4114_v39  ;;  %1346 = vmatpush.bf16.msra.mxu2 %v3328_v34  ;;  %v3327_v39 = vld [vmem:[#allocation8 + $0x98] sm:$0xff]  ;;  %v524_v34 = vperm.slane %v4128_v33, 3 }
  0xa0   : > { %1366 = vmatpush.bf16.msra.mxu3 %v3335_v48 }
  0xa1   : > { %1310 = vmatpush.bf16.msra.mxu0 %v3310_v49 }
  0xa2   : > { %1329 = vmatpush.bf16.msra.mxu1 %v3318_v24 }
  0xa3   : > { %1347 = vmatpush.bf16.msra.mxu2 %v3327_v39 }
  0xa4   : > { %1367 = vmatpush.bf16.msra.mxu3 %v3334_v56 }
  0xa5   : > { %1311 = vmatpush.bf16.msra.mxu0 %v3309_v23 }
  0xa6   : > { %1330 = vmatpush.bf16.msra.mxu1 %v3317_v26  ;;  %v523_v26 = vperm.slane %v4128_v33, 2 }
  0xa7   : > { %1348 = vmatpush.bf16.msra.mxu2 %v3326_v42 }
  0xa8   : > { %1368 = vmatpush.bf16.msra.mxu3 %v3333_v2 }
  0xa9   : > { %1312 = vmatpush.bf16.msra.mxu0 %v3308_v25 }
  0xaa   : > { %1331 = vmatpush.bf16.msra.mxu1 %v3316_v28 }
  0xab   : > { %1349 = vmatpush.bf16.msra.mxu2 %v3325_v53 }
  0xac   : > { %1369 = vmatpush.bf16.msra.mxu3 %v3332_v7 }
  0xaf   : > { %1350 = vmatpush.bf16.msra.mxu2 %v3324_v59 }
  0xe9   : > { %v878_v35 = vpop.f32.mrf.mxu0 }
  0xea   : > { %v897_v38 = vpop.f32.mrf.mxu1  ;;  %v879_v41 = vadd.f32 %v878_v35, %v521_v37 }
  0xec   : > { %v898_v50 = vadd.f32 %v897_v38, %v879_v41 }
  0xee   : > { %v1021_v57 = vmax.f32 %v898_v50, 0.0 }
  0xf1   : > { %v916_v43 = vpop.f32.mrf.mxu2  ;;  %v880_v47 = vpop.f32.mrf.mxu0 }
  0xf2   : > { %v935_v46 = vpop.f32.mrf.mxu3  ;;  %v881_v51 = vadd.f32 %v880_v47, %v521_v37  ;;  %v899_v52 = vpop.f32.mrf.mxu1  ;;  %v917_v55 = vadd.f32 %v916_v43, %v522_v45 }
  0xf4   : > { %v900_v54 = vadd.f32 %v899_v52, %v881_v51  ;;  %v936_v62 = vadd.f32 %v935_v46, %v917_v55 }
  0xf6   : > { %v1025_v58 = vmax.f32 %v900_v54, 0.0  ;;  %v1022_v5 = vmax.f32 %v936_v62, 0.0 }
  0xf8   : > { %v1037_v60 = vpack.c.bf16 %v1025_v58, %v1021_v57 }
  0xf9   : > { %v918_v61 = vpop.f32.mrf.mxu2  ;;  %v883_v1 = vpop.f32.mrf.mxu0 }
  0xfa   : > { %v919_v63 = vadd.f32 %v918_v61, %v522_v45  ;;  %v937_v0 = vpop.f32.mrf.mxu3  ;;  %v902_v3 = vpop.f32.mrf.mxu1  ;;  %1313 = vmatmul.bf16.vlgmr.msra.gmra.mxu0 %v1037_v60  ;;  %v884_v8 = vadd.f32 %v883_v1, %v521_v37 }
  0xfc   : > { %v938_v4 = vadd.f32 %v937_v0, %v919_v63  ;;  %v903_v13 = vadd.f32 %v902_v3, %v884_v8 }
  0xfe   : > { %v1026_v6 = vmax.f32 %v938_v4, 0.0  ;;  %v1029_v18 = vmax.f32 %v903_v13, 0.0  ;;  %v2962_v13 = vld [vmem:[#allocation11 + $0xe0] sm:$0xf] }
 0x100   : > { %v1038_v9 = vpack.c.bf16 %v1026_v6, %v1022_v5 }
 0x101   : > { %v921_v10 = vpop.f32.mrf.mxu2  ;;  %v885_v12 = vpop.f32.mrf.mxu0 }
 0x102   : > { %v940_v11 = vpop.f32.mrf.mxu3  ;;  %1332 = vmatmul.bf16.vlgmr.msra.gmra.mxu1 %v1038_v9  ;;  %v886_v14 = vadd.f32 %v885_v12, %v521_v37  ;;  %v904_v15 = vpop.f32.mrf.mxu1  ;;  %v922_v17 = vadd.f32 %v921_v10, %v522_v45  ;;  %v3371_v12 = vld [vmem:[#allocation11 + $0xf4] sm:$0xf0] }
 0x104   : > { %v905_v16 = vadd.f32 %v904_v15, %v886_v14  ;;  %v941_v44 = vadd.f32 %v940_v11, %v922_v17  ;;  %v2970_v11 = vld [vmem:[#allocation11 + $0xe8] sm:$0xf]  ;;  %v3370_v15 = vld [vmem:[#allocation11 + $0xec] sm:$0xf0]  ;;  %v2964_v17 = vld [vmem:[#allocation11 + $0xf0] sm:$0xf0] }
 0x105   : > { %v2971_v14 = vor.u32 %v3371_v12, %v2970_v11  ;;  %v3350_v11 = vld [vmem:[#allocation11 + $0x4c] sm:$0xf0]  ;;  %v3348_v12 = vld [vmem:[#allocation11 + $0x44] sm:$0xf] }
 0x106   : > { %v1033_v19 = vmax.f32 %v905_v16, 0.0  ;;  %v1030_v27 = vmax.f32 %v941_v44, 0.0  ;;  %v3368_v16 = vld [vmem:[#allocation11 + $0xe4] sm:$0xf] }
 0x107   : > { %1627 = vmatpush.bf16.msrb.mxu2 %v2971_v14 }
 0x108   : > { %v1041_v21 = vpack.c.bf16 %v1033_v19, %v1029_v18  ;;  %v2963_v18 = vor.u32 %v3370_v15, %v2962_v13  ;;  %v2967_v19 = vor.u32 %v3368_v16, %v2964_v17  ;;  %v2884_v13 = vld [vmem:[#allocation11 + $0x50] sm:$0xf0]  ;;  %v3349_v16 = vld [vmem:[#allocation11 + $0x4c] sm:$0xf]  ;;  %v2892_v17 = vld [vmem:[#allocation11 + $0x58] sm:$0xf0] }
 0x109   : > { %v923_v20 = vpop.f32.mrf.mxu2  ;;  %v954_v23 = vpop.f32.mrf.mxu0  ;;  %v2887_v15 = vor.u32 %v3348_v12, %v2884_v13  ;;  %v3082_v12 = vld [vmem:[#allocation13 + $0xd0] sm:$0xf]  ;;  %v3399_v13 = vld [vmem:[#allocation13 + $0xd4] sm:$0xf0] }
 0x10a   : > { %v924_v49 = vadd.f32 %v923_v20, %v522_v45  ;;  %v942_v22 = vpop.f32.mrf.mxu3  ;;  %v973_v24 = vpop.f32.mrf.mxu1  ;;  %1318 = vmatmul.bf16.gmra.mxu0 %v1041_v21  ;;  %v955_v29 = vadd.f32 %v954_v23, %v523_v26  ;;  %v3369_v20 = vld [vmem:[#allocation11 + $0xec] sm:$0xf]  ;;  %v2972_v21 = vld [vmem:[#allocation11 + $0xf8] sm:$0xf0]  ;;  %1608 = vmatpush.bf16.msrb.mxu1 %v2967_v19  ;;  %v2946_v23 = vld [vmem:[#allocation11 + $0xc0] sm:$0xf]  ;;  %v2895_v19 = vor.u32 %v3349_v16, %v2892_v17 }
 0x10b   : > { %v2975_v44 = vor.u32 %v3369_v20, %v2972_v21  ;;  %1589 = vmatpush.bf16.msrb.mxu0 %v2963_v18  ;;  %v2874_v18 = vld [vmem:[#allocation11 + $0x28] sm:$0xf]  ;;  %v3347_v20 = vld [vmem:[#allocation11 + $0x34] sm:$0xf0] }
 0x10c   : > { %v943_v25 = vadd.f32 %v942_v22, %v924_v49  ;;  %v974_v37 = vadd.f32 %v973_v24, %v955_v29  ;;  %v2954_v49 = vld [vmem:[#allocation11 + $0xc8] sm:$0xf]  ;;  %v3367_v22 = vld [vmem:[#allocation11 + $0xd4] sm:$0xf0]  ;;  %v2875_v21 = vor.u32 %v3347_v20, %v2874_v18 }
 0x10d   : > { %1646 = vmatpush.bf16.msrb.mxu3 %v2975_v44  ;;  %v2955_v24 = vor.u32 %v3367_v22, %v2954_v49  ;;  %v2866_v44 = vld [vmem:[#allocation11 + $0x20] sm:$0xf]  ;;  %v3346_v49 = vld [vmem:[#allocation11 + $0x2c] sm:$0xf0]  ;;  %v3344_v22 = vld [vmem:[#allocation11 + $0x24] sm:$0xf] }
 0x10e   : > { %v1034_v28 = vmax.f32 %v943_v25, 0.0  ;;  %v1023_v41 = vmax.f32 %v974_v37, 0.0  ;;  %v3366_v25 = vld [vmem:[#allocation11 + $0xcc] sm:$0xf0]  ;;  %v3417_v18 = vld [vmem:[#allocation13 + $0x164] sm:$0xf0] }
 0x10f   : > { %1628 = vmatpush.bf16.msrb.mxu2 %v2955_v24  ;;  %v3362_v37 = vld [vmem:[#allocation11 + $0xac] sm:$0xf0]  ;;  %v2868_v24 = vld [vmem:[#allocation11 + $0x30] sm:$0xf0]  ;;  %v3433_v20 = vld [vmem:[#allocation13 + $0x1e4] sm:$0xf0] }
 0x110   : > { %v1042_v30 = vpack.c.bf16 %v1034_v28, %v1030_v27  ;;  %v2948_v27 = vld [vmem:[#allocation11 + $0xd0] sm:$0xf0]  ;;  %v2947_v28 = vor.u32 %v3366_v25, %v2946_v23  ;;  %v2867_v23 = vor.u32 %v3346_v49, %v2866_v44  ;;  %v3345_v25 = vld [vmem:[#allocation11 + $0x2c] sm:$0xf] }
 0x111   : > { %v992_v31 = vpop.f32.mrf.mxu2  ;;  %v956_v35 = vpop.f32.mrf.mxu0 }
 0x112   : > { %v1011_v32 = vpop.f32.mrf.mxu3  ;;  %1337 = vmatmul.bf16.gmra.mxu1 %v1042_v30  ;;  %v975_v36 = vpop.f32.mrf.mxu1  ;;  %v957_v38 = vadd.f32 %v956_v35, %v523_v26  ;;  %v993_v40 = vadd.f32 %v992_v31, %v524_v34  ;;  %v3365_v30 = vld [vmem:[#allocation11 + $0xcc] sm:$0xf]  ;;  %v2956_v31 = vld [vmem:[#allocation11 + $0xd8] sm:$0xf0]  ;;  %v3363_v35 = vld [vmem:[#allocation11 + $0xb4] sm:$0xf0]  ;;  %1590 = vmatpush.bf16.msrb.mxu0 %v2947_v28 }
 0x114   : > { %v976_v39 = vadd.f32 %v975_v36, %v957_v38  ;;  %v1012_v47 = vadd.f32 %v1011_v32, %v993_v40  ;;  %v2938_v32 = vld [vmem:[#allocation11 + $0xa8] sm:$0xf]  ;;  %v2930_v36 = vld [vmem:[#allocation11 + $0xa0] sm:$0xf]  ;;  %v3360_v40 = vld [vmem:[#allocation11 + $0xa4] sm:$0xf] }
 0x115   : > { %v2939_v38 = vor.u32 %v3363_v35, %v2938_v32  ;;  %v3340_v35 = vld [vmem:[#allocation11 + $0x4] sm:$0xf] }
 0x116   : > { %v1027_v42 = vmax.f32 %v976_v39, 0.0  ;;  %v1024_v53 = vmax.f32 %v1012_v47, 0.0  ;;  %v2931_v39 = vor.u32 %v3362_v37, %v2930_v36  ;;  %v2922_v47 = vld [vmem:[#allocation11 + $0x88] sm:$0xf]  ;;  %v2852_v36 = vld [vmem:[#allocation11 + $0x10] sm:$0xf0] }
 0x117   : > { %1629 = vmatpush.bf16.msrb.mxu2 %v2939_v38  ;;  %v2855_v38 = vor.u32 %v3340_v35, %v2852_v36 }
 0x118   : > { %v1039_v43 = vpack.c.bf16 %v1027_v42, %v1023_v41  ;;  %v2932_v41 = vld [vmem:[#allocation11 + $0xb0] sm:$0xf0]  ;;  %v3361_v42 = vld [vmem:[#allocation11 + $0xac] sm:$0xf]  ;;  %1591 = vmatpush.bf16.msrb.mxu0 %v2931_v39 }
 0x119   : > { %v994_v45 = vpop.f32.mrf.mxu2  ;;  %v959_v50 = vpop.f32.mrf.mxu0  ;;  %v3341_v39 = vld [vmem:[#allocation11 + $0xc] sm:$0xf] }
 0x11a   : > { %v1013_v46 = vpop.f32.mrf.mxu3  ;;  %v995_v48 = vadd.f32 %v994_v45, %v524_v34  ;;  %v978_v51 = vpop.f32.mrf.mxu1  ;;  %1351 = vmatmul.bf16.vlgmr.msra.gmra.mxu2 %v1039_v43  ;;  %v960_v33 = vadd.f32 %v959_v50, %v523_v26  ;;  %v2935_v43 = vor.u32 %v3360_v40, %v2932_v41  ;;  %v2940_v45 = vld [vmem:[#allocation11 + $0xb8] sm:$0xf0]  ;;  %v2914_v50 = vld [vmem:[#allocation11 + $0x80] sm:$0xf] }
 0x11b   : > { %v2860_v40 = vld [vmem:[#allocation11 + $0x18] sm:$0xf0] }
 0x11c   : > { %v1014_v52 = vadd.f32 %v1013_v46, %v995_v48  ;;  %v979_v59 = vadd.f32 %v978_v51, %v960_v33  ;;  %v2943_v46 = vor.u32 %v3361_v42, %v2940_v45  ;;  %v3359_v48 = vld [vmem:[#allocation11 + $0x94] sm:$0xf0]  ;;  %v2863_v41 = vor.u32 %v3341_v39, %v2860_v40 }
 0x11d   : > { %v2923_v51 = vor.u32 %v3359_v48, %v2922_v47 }
 0x11e   : > { %v1028_v54 = vmax.f32 %v1014_v52, 0.0  ;;  %v1031_v0 = vmax.f32 %v979_v59, 0.0  ;;  %v3358_v52 = vld [vmem:[#allocation11 + $0x8c] sm:$0xf0] }
 0x11f   : > { %v2915_v33 = vor.u32 %v3358_v52, %v2914_v50  ;;  %1630 = vmatpush.bf16.msrb.mxu2 %v2923_v51  ;;  %v3034_v52 = vld [vmem:[#allocation13 + $0x70] sm:$0xf] }
 0x120   : > { %v1040_v55 = vpack.c.bf16 %v1028_v54, %v1024_v53  ;;  %v3356_v53 = vld [vmem:[#allocation11 + $0x84] sm:$0xf]  ;;  %v2916_v54 = vld [vmem:[#allocation11 + $0x90] sm:$0xf0] }
 0x121   : > { %v997_v56 = vpop.f32.mrf.mxu2  ;;  %v961_v58 = vpop.f32.mrf.mxu0  ;;  %1592 = vmatpush.bf16.msrb.mxu0 %v2915_v33 }
 0x122   : > { %v1016_v57 = vpop.f32.mrf.mxu3  ;;  %1370 = vmatmul.bf16.vlgmr.msra.gmra.mxu3 %v1040_v55  ;;  %v962_v60 = vadd.f32 %v961_v58, %v523_v26  ;;  %v980_v61 = vpop.f32.mrf.mxu1  ;;  %v998_v63 = vadd.f32 %v997_v56, %v524_v34  ;;  %v3364_v26 = vld [vmem:[#allocation11 + $0xc4] sm:$0xf]  ;;  %v2919_v55 = vor.u32 %v3356_v53, %v2916_v54  ;;  %v3357_v56 = vld [vmem:[#allocation11 + $0x8c] sm:$0xf]  ;;  %v2906_v58 = vld [vmem:[#allocation11 + $0x68] sm:$0xf] }
 0x123   : > { %v2951_v29 = vor.u32 %v3364_v26, %v2948_v27  ;;  %v2876_v26 = vld [vmem:[#allocation11 + $0x38] sm:$0xf0]  ;;  %v2871_v27 = vor.u32 %v3344_v22, %v2868_v24  ;;  %v3387_v53 = vld [vmem:[#allocation13 + $0x74] sm:$0xf0]  ;;  %v3098_v54 = vld [vmem:[#allocation13 + $0xf0] sm:$0xf]  ;;  %v3083_v24 = vor.u32 %v3399_v13, %v3082_v12 }
 0x124   : > { %v981_v62 = vadd.f32 %v980_v61, %v962_v60  ;;  %v1017_v4 = vadd.f32 %v1016_v57, %v998_v63  ;;  %v2924_v57 = vld [vmem:[#allocation11 + $0x98] sm:$0xf0]  ;;  %v3355_v60 = vld [vmem:[#allocation11 + $0x74] sm:$0xf0]  ;;  %v3354_v63 = vld [vmem:[#allocation11 + $0x6c] sm:$0xf0]  ;;  %v2879_v28 = vor.u32 %v3345_v25, %v2876_v26 }
 0x125   : > { %1609 = vmatpush.bf16.msrb.mxu1 %v2951_v29  ;;  %v2927_v59 = vor.u32 %v3357_v56, %v2924_v57  ;;  %v2907_v61 = vor.u32 %v3355_v60, %v2906_v58  ;;  %v2858_v29 = vld [vmem:[#allocation11 + $0x8] sm:$0xf]  ;;  %v3403_v56 = vld [vmem:[#allocation13 + $0xf4] sm:$0xf0]  ;;  %v3026_v57 = vld [vmem:[#allocation13 + $0x60] sm:$0xf] }
 0x126   : > { %v1035_v1 = vmax.f32 %v981_v62, 0.0  ;;  %v1032_v8 = vmax.f32 %v1017_v4, 0.0  ;;  %v2898_v62 = vld [vmem:[#allocation11 + $0x60] sm:$0xf]  ;;  %v2908_v4 = vld [vmem:[#allocation11 + $0x78] sm:$0xf0] }
 0x127   : > { %1631 = vmatpush.bf16.msrb.mxu2 %v2907_v61  ;;  %v3385_v58 = vld [vmem:[#allocation13 + $0x64] sm:$0xf0]  ;;  %v3099_v61 = vor.u32 %v3403_v56, %v3098_v54  ;;  %v3146_v25 = vld [vmem:[#allocation13 + $0x150] sm:$0xf]  ;;  %v3415_v26 = vld [vmem:[#allocation13 + $0x154] sm:$0xf0] }
 0x128   : > { %v1043_v3 = vpack.c.bf16 %v1035_v1, %v1031_v0  ;;  %v3352_v0 = vld [vmem:[#allocation11 + $0x64] sm:$0xf]  ;;  %v2899_v1 = vor.u32 %v3354_v63, %v2898_v62  ;;  %v3090_v62 = vld [vmem:[#allocation13 + $0xe0] sm:$0xf]  ;;  %v3401_v63 = vld [vmem:[#allocation13 + $0xe4] sm:$0xf0] }
 0x129   : > { %v999_v2 = vpop.f32.mrf.mxu2  ;;  %1610 = vmatpush.bf16.msrb.mxu1 %v2935_v43  ;;  %v3393_v12 = vld [vmem:[#allocation13 + $0xa4] sm:$0xf0]  ;;  %v3130_v13 = vld [vmem:[#allocation13 + $0x130] sm:$0xf] }
 0x12a   : > { %v1000_v5 = vadd.f32 %v999_v2, %v524_v34  ;;  %v1018_v6 = vpop.f32.mrf.mxu3  ;;  %1356 = vmatmul.bf16.gmra.mxu2 %v1043_v3  ;;  %v2959_v34 = vor.u32 %v3365_v30, %v2956_v31  ;;  %v2900_v2 = vld [vmem:[#allocation11 + $0x70] sm:$0xf0]  ;;  %v3353_v3 = vld [vmem:[#allocation11 + $0x6c] sm:$0xf]  ;;  %1593 = vmatpush.bf16.msrb.mxu0 %v2899_v1  ;;  %v3343_v30 = vld [vmem:[#allocation11 + $0x14] sm:$0xf0]  ;;  %v3027_v1 = vor.u32 %v3385_v58, %v3026_v57 }
 0x12b   : > { %v2850_v31 = vld [vmem:[#allocation11] sm:$0xf]  ;;  %v2859_v32 = vor.u32 %v3343_v30, %v2858_v29  ;;  %v3381_v30 = vld [vmem:[#allocation13 + $0x44] sm:$0xf0] }
 0x12c   : > { %v1019_v7 = vadd.f32 %v1018_v6, %v1000_v5  ;;  %1647 = vmatpush.bf16.msrb.mxu3 %v2959_v34  ;;  %v2903_v5 = vor.u32 %v3352_v0, %v2900_v2  ;;  %v2911_v6 = vor.u32 %v3353_v3, %v2908_v4  ;;  %v3342_v34 = vld [vmem:[#allocation11 + $0xc] sm:$0xf0]  ;;  %v3419_v2 = vld [vmem:[#allocation13 + $0x174] sm:$0xf0] }
 0x12d   : > { %1611 = vmatpush.bf16.msrb.mxu1 %v2919_v55  ;;  %v2851_v37 = vor.u32 %v3342_v34, %v2850_v31  ;;  %v3035_v55 = vor.u32 %v3387_v53, %v3034_v52  ;;  %v3162_v0 = vld [vmem:[#allocation13 + $0x170] sm:$0xf]  ;;  %v3074_v31 = vld [vmem:[#allocation13 + $0xc0] sm:$0xf]  ;;  %v3147_v34 = vor.u32 %v3415_v26, %v3146_v25  ;;  %v3409_v25 = vld [vmem:[#allocation13 + $0x124] sm:$0xf0] }
 0x12e   : > { %v1036_v9 = vmax.f32 %v1019_v7, 0.0  ;;  %v2890_v7 = vld [vmem:[#allocation11 + $0x48] sm:$0xf]  ;;  %v3226_v3 = vld [vmem:[#allocation13 + $0x1f0] sm:$0xf] }
 0x12f   : > { %v3186_v26 = vld [vmem:[#allocation13 + $0x1a0] sm:$0xf] }
 0x130   : > { %v1044_v10 = vpack.c.bf16 %v1036_v9, %v1032_v8  ;;  %1648 = vmatpush.bf16.msrb.mxu3 %v2943_v46  ;;  %v3351_v8 = vld [vmem:[#allocation11 + $0x54] sm:$0xf0]  ;;  %v2882_v9 = vld [vmem:[#allocation11 + $0x40] sm:$0xf]  ;;  %v4134_v46 = vld [vmem:[#allocation10] ss:$0 sm:$0xff] }
 0x131   : > { %1612 = vmatpush.bf16.msrb.mxu1 %v2903_v5  ;;  %v2883_v14 = vor.u32 %v3350_v11, %v2882_v9  ;;  %v3018_v9 = vld [vmem:[#allocation13 + $0x50] sm:$0xf] }
 0x132   : > { %1375 = vmatmul.bf16.gmra.mxu3 %v1044_v10  ;;  %v2891_v10 = vor.u32 %v3351_v8, %v2890_v7  ;;  %v3163_v7 = vor.u32 %v3419_v2, %v3162_v0  ;;  %v3435_v8 = vld [vmem:[#allocation13 + $0x1f4] sm:$0xf0]  ;;  %v3138_v2 = vld [vmem:[#allocation13 + $0x140] sm:$0xf] }
 0x133   : > { %1594 = vmatpush.bf16.msrb.mxu0 %v2883_v14  ;;  %v3227_v11 = vor.u32 %v3435_v8, %v3226_v3  ;;  %v3154_v14 = vld [vmem:[#allocation13 + $0x160] sm:$0xf]  ;;  %v3413_v3 = vld [vmem:[#allocation13 + $0x144] sm:$0xf0] }
 0x134   : > { %1649 = vmatpush.bf16.msrb.mxu3 %v2927_v59  ;;  %1632 = vmatpush.bf16.msrb.mxu2 %v2891_v10  ;;  %v3383_v10 = vld [vmem:[#allocation13 + $0x54] sm:$0xf0]  ;;  %v3155_v44 = vor.u32 %v3417_v18, %v3154_v14  ;;  %v2994_v8 = vld [vmem:[#allocation13 + $0x20] sm:$0xf] }
 0x135   : > { %1613 = vmatpush.bf16.msrb.mxu1 %v2887_v15  ;;  %v3411_v14 = vld [vmem:[#allocation13 + $0x134] sm:$0xf0] }
 0x136   : > { %v3427_v18 = vld [vmem:[#allocation13 + $0x1b4] sm:$0xf0] }
 0x137   : > { %1595 = vmatpush.bf16.msrb.mxu0 %v2867_v23 }
 0x138   : > { %1650 = vmatpush.bf16.msrb.mxu3 %v2911_v6  ;;  %1633 = vmatpush.bf16.msrb.mxu2 %v2875_v21  ;;  %v3091_v6 = vor.u32 %v3401_v63, %v3090_v62  ;;  %v3019_v21 = vor.u32 %v3383_v10, %v3018_v9  ;;  %v3379_v62 = vld [vmem:[#allocation13 + $0x34] sm:$0xf0]  ;;  %v3066_v63 = vld [vmem:[#allocation13 + $0xb0] sm:$0xf]  ;;  %v3377_v9 = vld [vmem:[#allocation13 + $0x24] sm:$0xf0] }
 0x139   : > { %1614 = vmatpush.bf16.msrb.mxu1 %v2871_v27  ;;  %v3058_v10 = vld [vmem:[#allocation13 + $0xa0] sm:$0xf] }
 0x13b   : > { %1596 = vmatpush.bf16.msrb.mxu0 %v2851_v37  ;;  %v3210_v37 = vld [vmem:[#allocation13 + $0x1d0] sm:$0xf] }
 0x13c   : > { %1651 = vmatpush.bf16.msrb.mxu3 %v2895_v19  ;;  %1634 = vmatpush.bf16.msrb.mxu2 %v2859_v32  ;;  %v3218_v19 = vld [vmem:[#allocation13 + $0x1e0] sm:$0xf]  ;;  %v3397_v32 = vld [vmem:[#allocation13 + $0xc4] sm:$0xf0] }
 0x13d   : > { %1615 = vmatpush.bf16.msrb.mxu1 %v2855_v38  ;;  %v3219_v49 = vor.u32 %v3433_v20, %v3218_v19  ;;  %v3431_v38 = vld [vmem:[#allocation13 + $0x1d4] sm:$0xf0]  ;;  %v2986_v20 = vld [vmem:[#allocation13 + $0x10] sm:$0xf] }
 0x13f   : > { %2079 = vmatpush.bf16.msra.mxu0 %v3035_v55 }
 0x140   : > { %1652 = vmatpush.bf16.msrb.mxu3 %v2879_v28  ;;  %2117 = vmatpush.bf16.msra.mxu2 %v3163_v7  ;;  %v3010_v28 = vld [vmem:[#allocation13 + $0x40] sm:$0xf] }
 0x141   : > { %2098 = vmatpush.bf16.msra.mxu1 %v3099_v61  ;;  %v3011_v40 = vor.u32 %v3381_v30, %v3010_v28  ;;  %v3002_v61 = vld [vmem:[#allocation13 + $0x30] sm:$0xf]  ;;  %v3425_v28 = vld [vmem:[#allocation13 + $0x1a4] sm:$0xf0]  ;;  %v2978_v30 = vld [vmem:[#allocation13] sm:$0xf] }
 0x142   : > { %v3003_v0 = vor.u32 %v3379_v62, %v3002_v61  ;;  %v3092_v61 = vld [vmem:[#allocation13 + $0xe8] sm:$0xf0] }
 0x143   : > { %2080 = vmatpush.bf16.msra.mxu0 %v3027_v1  ;;  %v3395_v1 = vld [vmem:[#allocation13 + $0xb4] sm:$0xf0] }
 0x144   : > { %1653 = vmatpush.bf16.msrb.mxu3 %v2863_v41  ;;  %2118 = vmatpush.bf16.msra.mxu2 %v3155_v44  ;;  %v3075_v41 = vor.u32 %v3397_v32, %v3074_v31  ;;  %v3373_v31 = vld [vmem:[#allocation13 + $0x4] sm:$0xf0]  ;;  %v3042_v32 = vld [vmem:[#allocation13 + $0x80] sm:$0xf] }
 0x145   : > { %2099 = vmatpush.bf16.msra.mxu1 %v3091_v6  ;;  %v3429_v6 = vld [vmem:[#allocation13 + $0x1c4] sm:$0xf0] }
 0x147   : > { %2081 = vmatpush.bf16.msra.mxu0 %v3019_v21  ;;  %v3375_v21 = vld [vmem:[#allocation13 + $0x14] sm:$0xf0] }
 0x148   : > { %2136 = vmatpush.bf16.msra.mxu3 %v3227_v11  ;;  %2119 = vmatpush.bf16.msra.mxu2 %v3147_v34  ;;  %v2995_v11 = vor.u32 %v3377_v9, %v2994_v8  ;;  %v2987_v44 = vor.u32 %v3375_v21, %v2986_v20  ;;  %v2979_v34 = vor.u32 %v3373_v31, %v2978_v30  ;;  %v3084_v8 = vld [vmem:[#allocation13 + $0xd8] sm:$0xf0]  ;;  %v3076_v20 = vld [vmem:[#allocation13 + $0xc8] sm:$0xf0]  ;;  %v3414_v21 = vld [vmem:[#allocation13 + $0x154] sm:$0xf] }
 0x149   : > { %2100 = vmatpush.bf16.msra.mxu1 %v3083_v24  ;;  %v3122_v24 = vld [vmem:[#allocation13 + $0x120] sm:$0xf]  ;;  %v3068_v31 = vld [vmem:[#allocation13 + $0xb8] sm:$0xf0] }
 0x14b   : > { %2082 = vmatpush.bf16.msra.mxu0 %v3011_v40 }
 0x14c   : > { %2137 = vmatpush.bf16.msra.mxu3 %v3219_v49  ;;  %v3050_v49 = vld [vmem:[#allocation13 + $0x90] sm:$0xf] }
 0x14d   : > { %2101 = vmatpush.bf16.msra.mxu1 %v3075_v41  ;;  %v3423_v41 = vld [vmem:[#allocation13 + $0x194] sm:$0xf0] }
 0x14f   : > { %2083 = vmatpush.bf16.msra.mxu0 %v3003_v0  ;;  %v3164_v0 = vld [vmem:[#allocation13 + $0x178] sm:$0xf0] }
 0x153   : > { %2084 = vmatpush.bf16.msra.mxu0 %v2995_v11  ;;  %v3156_v11 = vld [vmem:[#allocation13 + $0x168] sm:$0xf0] }
 0x157   : > { %2085 = vmatpush.bf16.msra.mxu0 %v2987_v44  ;;  %v3148_v44 = vld [vmem:[#allocation13 + $0x158] sm:$0xf0] }
 0x15b   : > { %2086 = vmatpush.bf16.msra.mxu0 %v2979_v34 }
 0x177   : > { %v1314_v42 = vpop.f32.mrf.mxu0 }
 0x178   : > { %v1315_v50 = vadd.f32 %v4134_v46, %v1314_v42  ;;  %v3211_v42 = vor.u32 %v3431_v38, %v3210_v37  ;;  %v3114_v37 = vld [vmem:[#allocation13 + $0x110] sm:$0xf]  ;;  %v3407_v38 = vld [vmem:[#allocation13 + $0x114] sm:$0xf0] }
 0x179   : > { %v3115_v40 = vor.u32 %v3407_v38, %v3114_v37  ;;  %v3140_v37 = vld [vmem:[#allocation13 + $0x148] sm:$0xf0]  ;;  %v3428_v38 = vld [vmem:[#allocation13 + $0x1c4] sm:$0xf] }
 0x17a   : > { %2138 = vmatpush.bf16.msra.mxu3 %v3211_v42 }
 0x17f   : > { %v1333_v43 = vpop.f32.mrf.mxu1  ;;  %v1316_v47 = vpop.f32.mrf.mxu0 }
 0x180   : > { %v1334_v59 = vadd.f32 %v1333_v43, %v1315_v50  ;;  %v1317_v60 = vadd.f32 %v4134_v46, %v1316_v47 }
 0x187   : > { %v1335_v48 = vpop.f32.mrf.mxu1  ;;  %v1319_v15 = vpop.f32.mrf.mxu0 }
 0x188   : > { %v1336_v4 = vadd.f32 %v1335_v48, %v1317_v60  ;;  %v1320_v47 = vadd.f32 %v4134_v46, %v1319_v15  ;;  %v3059_v15 = vor.u32 %v3393_v12, %v3058_v10  ;;  %v3416_v10 = vld [vmem:[#allocation13 + $0x164] sm:$0xf] }
 0x189   : > { %v3432_v12 = vld [vmem:[#allocation13 + $0x1e4] sm:$0xf] }
 0x18f   : > { %v1338_v22 = vpop.f32.mrf.mxu1  ;;  %v1321_v43 = vpop.f32.mrf.mxu0 }
 0x190   : > { %v1339_v50 = vadd.f32 %v1338_v22, %v1320_v47  ;;  %v3391_v22 = vld [vmem:[#allocation13 + $0x94] sm:$0xf0]  ;;  %v3402_v47 = vld [vmem:[#allocation13 + $0xf4] sm:$0xf] }
 0x197   : > { %v1340_v48 = vpop.f32.mrf.mxu1 }
 0x19d   : > { %v1352_v45 = vpop.f32.mrf.mxu2 }
 0x19e   : > { %v1353_v5 = vadd.f32 %v1352_v45, %v1334_v59 }
 0x1a5   : > { %v1371_v51 = vpop.f32.mrf.mxu3  ;;  %v1354_v33 = vpop.f32.mrf.mxu2 }
 0x1a6   : > { %v1372_v16 = vadd.f32 %v1371_v51, %v1353_v5  ;;  %v1355_v17 = vadd.f32 %v1354_v33, %v1336_v4  ;;  %v1322_v51 = vadd.f32 %v4134_v46, %v1321_v43  ;;  %v3067_v46 = vor.u32 %v3395_v1, %v3066_v63  ;;  %v3202_v5 = vld [vmem:[#allocation13 + $0x1c0] sm:$0xf]  ;;  %v3386_v43 = vld [vmem:[#allocation13 + $0x74] sm:$0xf] }
 0x1a7   : > { %v3139_v4 = vor.u32 %v3413_v3, %v3138_v2  ;;  %v3203_v7 = vor.u32 %v3429_v6, %v3202_v5  ;;  %v3418_v63 = vld [vmem:[#allocation13 + $0x174] sm:$0xf]  ;;  %v3228_v2 = vld [vmem:[#allocation13 + $0x1f8] sm:$0xf0] }
 0x1a8   : > { %v1381_v35 = vmax.f32 %v1372_v16, 0.0  ;;  %v1341_v53 = vadd.f32 %v1340_v48, %v1322_v51  ;;  %2102 = vmatpush.bf16.msra.mxu1 %v3067_v46  ;;  %v3131_v16 = vor.u32 %v3411_v14, %v3130_v13  ;;  %v3434_v1 = vld [vmem:[#allocation13 + $0x1f4] sm:$0xf]  ;;  %v3167_v46 = vor.u32 %v3418_v63, %v3164_v0  ;;  %v3020_v5 = vld [vmem:[#allocation13 + $0x58] sm:$0xf0] }
 0x1a9   : > { %2120 = vmatpush.bf16.msra.mxu2 %v3139_v4  ;;  %2139 = vmatpush.bf16.msra.mxu3 %v3203_v7  ;;  %v3231_v3 = vor.u32 %v3434_v1, %v3228_v2  ;;  %v3382_v4 = vld [vmem:[#allocation13 + $0x54] sm:$0xf]  ;;  %v3159_v13 = vor.u32 %v3416_v10, %v3156_v11  ;;  %v3220_v14 = vld [vmem:[#allocation13 + $0x1e8] sm:$0xf0]  ;;  %v2988_v63 = vld [vmem:[#allocation13 + $0x18] sm:$0xf0] }
 0x1aa   : > { %v3398_v6 = vld [vmem:[#allocation13 + $0xd4] sm:$0xf]  ;;  %v3023_v7 = vor.u32 %v3382_v4, %v3020_v5  ;;  %v3408_v4 = vld [vmem:[#allocation13 + $0x124] sm:$0xf]  ;;  %v3124_v5 = vld [vmem:[#allocation13 + $0x128] sm:$0xf0] }
 0x1ab   : > { %v3087_v9 = vor.u32 %v3398_v6, %v3084_v8  ;;  %v3390_v0 = vld [vmem:[#allocation13 + $0x94] sm:$0xf]  ;;  %v3424_v10 = vld [vmem:[#allocation13 + $0x1a4] sm:$0xf]  ;;  %v3188_v11 = vld [vmem:[#allocation13 + $0x1a8] sm:$0xf0] }
 0x1ac   : > { %2103 = vmatpush.bf16.msra.mxu1 %v3059_v15  ;;  %v3223_v15 = vor.u32 %v3432_v12, %v3220_v14  ;;  %v3372_v12 = vld [vmem:[#allocation13 + $0x4] sm:$0xf] }
 0x1ad   : > { %v1373_v23 = vpop.f32.mrf.mxu3  ;;  %v1357_v29 = vpop.f32.mrf.mxu2  ;;  %2121 = vmatpush.bf16.msra.mxu2 %v3131_v16  ;;  %v3380_v16 = vld [vmem:[#allocation13 + $0x44] sm:$0xf] }
 0x1ae   : > { %v1374_v27 = vadd.f32 %v1373_v23, %v1355_v17  ;;  %v1358_v54 = vadd.f32 %v1357_v29, %v1339_v50  ;;  %v3194_v17 = vld [vmem:[#allocation13 + $0x1b0] sm:$0xf]  ;;  %v3051_v23 = vor.u32 %v3391_v22, %v3050_v49  ;;  %v3187_v29 = vor.u32 %v3425_v28, %v3186_v26  ;;  %v3100_v50 = vld [vmem:[#allocation13 + $0xf8] sm:$0xf0] }
 0x1af   : > { %v3195_v19 = vor.u32 %v3427_v18, %v3194_v17  ;;  %v3103_v51 = vor.u32 %v3402_v47, %v3100_v50  ;;  %v3012_v17 = vld [vmem:[#allocation13 + $0x48] sm:$0xf0]  ;;  %v3396_v18 = vld [vmem:[#allocation13 + $0xc4] sm:$0xf]  ;;  %v3151_v22 = vor.u32 %v3414_v21, %v3148_v44  ;;  %v3004_v28 = vld [vmem:[#allocation13 + $0x38] sm:$0xf0] }
 0x1b0   : > { %v1382_v36 = vmax.f32 %v1374_v27, 0.0  ;;  %v3123_v27 = vor.u32 %v3409_v25, %v3122_v24  ;;  %2104 = vmatpush.bf16.msra.mxu1 %v3051_v23  ;;  %v3079_v49 = vor.u32 %v3396_v18, %v3076_v20  ;;  %v3430_v23 = vld [vmem:[#allocation13 + $0x1d4] sm:$0xf]  ;;  %v3212_v24 = vld [vmem:[#allocation13 + $0x1d8] sm:$0xf0] }
 0x1b1   : > { %2140 = vmatpush.bf16.msra.mxu3 %v3195_v19  ;;  %v3015_v19 = vor.u32 %v3380_v16, %v3012_v17  ;;  %v1419_v25 = vld [vmem:[%s4221_s6] sm:$0xf]  ;;  %v3215_v26 = vor.u32 %v3430_v23, %v3212_v24  ;;  %v2996_v47 = vld [vmem:[#allocation13 + $0x28] sm:$0xf0]  ;;  %v3388_v17 = vld [vmem:[#allocation13 + $0x84] sm:$0xf] }
 0x1b2   : > { %v1385_v39 = vpack.c.bf16 %v1382_v36, %v1381_v35  ;;  %2122 = vmatpush.bf16.msra.mxu2 %v3123_v27  ;;  %v3389_v35 = vld [vmem:[#allocation13 + $0x84] sm:$0xf0]  ;;  %v3378_v27 = vld [vmem:[#allocation13 + $0x34] sm:$0xf]  ;;  %v2980_v16 = vld [vmem:[#allocation13 + $0x8] sm:$0xf0] }
 0x1b3   : > { %v3043_v36 = vor.u32 %v3389_v35, %v3042_v32  ;;  %v3007_v30 = vor.u32 %v3378_v27, %v3004_v28  ;;  %v3044_v18 = vld [vmem:[#allocation13 + $0x88] sm:$0xf0]  ;;  %v2983_v21 = vor.u32 %v3372_v12, %v2980_v16 }
 0x1b4   : > { %1597 = vmatmul.bf16.vlgmr.msrb.gmra.mxu0 %v1385_v39  ;;  %1616 = vmatmul.bf16.vlgmr.msrb.gmra.mxu1 %v1385_v39  ;;  %v3047_v44 = vor.u32 %v3388_v17, %v3044_v18 }
 0x1b5   : > { %1635 = vmatmul.bf16.vlgmr.msrb.gmra.mxu2 %v1385_v39  ;;  %1654 = vmatmul.bf16.vlgmr.msrb.gmra.mxu3 %v1385_v39  ;;  %v1376_v45 = vpop.f32.mrf.mxu3  ;;  %v1359_v52 = vpop.f32.mrf.mxu2  ;;  %v3178_v39 = vld [vmem:[#allocation13 + $0x190] sm:$0xf] }
 0x1b6   : > { %v1377_v33 = vadd.f32 %v1376_v45, %v1358_v54  ;;  %v1360_v55 = vadd.f32 %v1359_v52, %v1341_v53  ;;  %2141 = vmatpush.bf16.msra.mxu3 %v3187_v29  ;;  %2105 = vmatpush.bf16.msra.mxu1 %v3043_v36  ;;  %v3179_v42 = vor.u32 %v3423_v41, %v3178_v39  ;;  %v3036_v45 = vld [vmem:[#allocation13 + $0x78] sm:$0xf0]  ;;  %v3106_v52 = vld [vmem:[#allocation13 + $0x100] sm:$0xf]  ;;  %v3405_v53 = vld [vmem:[#allocation13 + $0x104] sm:$0xf0] }
 0x1b7   : > { %2123 = vmatpush.bf16.msra.mxu2 %v3115_v40  ;;  %v3039_v48 = vor.u32 %v3386_v43, %v3036_v45  ;;  %v3170_v54 = vld [vmem:[#allocation13 + $0x180] sm:$0xf]  ;;  %v3394_v29 = vld [vmem:[#allocation13 + $0xb4] sm:$0xf]  ;;  %v3412_v36 = vld [vmem:[#allocation13 + $0x144] sm:$0xf] }
 0x1b8   : > { %v1383_v58 = vmax.f32 %v1377_v33, 0.0  ;;  %v3107_v33 = vor.u32 %v3405_v53, %v3106_v52  ;;  %v3071_v35 = vor.u32 %v3394_v29, %v3068_v31  ;;  %v4143_v39 = vperm.slane %v1419_v25, 0  ;;  %v3376_v45 = vld [vmem:[#allocation13 + $0x24] sm:$0xf]  ;;  %v3410_v53 = vld [vmem:[#allocation13 + $0x134] sm:$0xf] }
 0x1b9   : > { %2155 = vmatpush.bf16.msrb.mxu0 %v3039_v48  ;;  %v4145_v40 = vperm.slane %v1419_v25, 1  ;;  %v3143_v41 = vor.u32 %v3412_v36, %v3140_v37  ;;  %v3392_v48 = vld [vmem:[#allocation13 + $0xa4] sm:$0xf]  ;;  %v2999_v50 = vor.u32 %v3376_v45, %v2996_v47  ;;  %v3108_v37 = vld [vmem:[#allocation13 + $0x108] sm:$0xf0] }
 0x1ba   : > { %2142 = vmatpush.bf16.msra.mxu3 %v3179_v42  ;;  %2174 = vmatpush.bf16.msrb.mxu1 %v3103_v51  ;;  %v3204_v42 = vld [vmem:[#allocation13 + $0x1c8] sm:$0xf0]  ;;  %v3404_v36 = vld [vmem:[#allocation13 + $0x104] sm:$0xf] }
 0x1bb   : > { %2124 = vmatpush.bf16.msra.mxu2 %v3107_v33  ;;  %v3207_v43 = vor.u32 %v3428_v38, %v3204_v42  ;;  %v3060_v51 = vld [vmem:[#allocation13 + $0xa8] sm:$0xf0]  ;;  %v3426_v33 = vld [vmem:[#allocation13 + $0x1b4] sm:$0xf]  ;;  %v3420_v38 = vld [vmem:[#allocation13 + $0x184] sm:$0xf]  ;;  %v3111_v47 = vor.u32 %v3404_v36, %v3108_v37 }
 0x1bc   : > { %v3063_v52 = vor.u32 %v3392_v48, %v3060_v51  ;;  %v3172_v48 = vld [vmem:[#allocation13 + $0x188] sm:$0xf0] }
 0x1bd   : > { %v1378_v56 = vpop.f32.mrf.mxu3 }
 0x1be   : > { %v1379_v57 = vadd.f32 %v1378_v56, %v1360_v55  ;;  %v3421_v55 = vld [vmem:[#allocation13 + $0x184] sm:$0xf0] }
 0x1bf   : > { %v3171_v56 = vor.u32 %v3421_v55, %v3170_v54  ;;  %2193 = vmatpush.bf16.msrb.mxu2 %v3167_v46  ;;  %v3132_v54 = vld [vmem:[#allocation13 + $0x138] sm:$0xf0]  ;;  %v4147_v55 = vperm.slane %v1419_v25, 2 }
 0x1c0   : > { %v1384_v59 = vmax.f32 %v1379_v57, 0.0  ;;  %v3384_v57 = vld [vmem:[#allocation13 + $0x64] sm:$0xf] }
 0x1c1   : > { %2143 = vmatpush.bf16.msra.mxu3 %v3171_v56  ;;  %v4149_v56 = vperm.slane %v1419_v25, 3  ;;  %v3422_v25 = vld [vmem:[#allocation13 + $0x194] sm:$0xf] }
 0x1c2   : > { %v1386_v60 = vpack.c.bf16 %v1384_v59, %v1383_v58  ;;  %v3028_v58 = vld [vmem:[#allocation13 + $0x68] sm:$0xf0]  ;;  %v3400_v59 = vld [vmem:[#allocation13 + $0xe4] sm:$0xf] }
 0x1c3   : > { %v3095_v62 = vor.u32 %v3400_v59, %v3092_v61  ;;  %2194 = vmatpush.bf16.msrb.mxu2 %v3159_v13 }
 0x1c4   : > { %1602 = vmatmul.bf16.gmra.mxu0 %v1386_v60  ;;  %1621 = vmatmul.bf16.gmra.mxu1 %v1386_v60 }
 0x1c5   : > { %1640 = vmatmul.bf16.gmra.mxu2 %v1386_v60  ;;  %1659 = vmatmul.bf16.gmra.mxu3 %v1386_v60  ;;  %v3031_v60 = vor.u32 %v3384_v57, %v3028_v58  ;;  %v3135_v57 = vor.u32 %v3410_v53, %v3132_v54  ;;  %v3196_v58 = vld [vmem:[#allocation13 + $0x1b8] sm:$0xf0] }
 0x1c6   : > { %2175 = vmatpush.bf16.msrb.mxu1 %v3095_v62  ;;  %2212 = vmatpush.bf16.msrb.mxu3 %v3231_v3  ;;  %v3199_v61 = vor.u32 %v3426_v33, %v3196_v58  ;;  %v3374_v62 = vld [vmem:[#allocation13 + $0x14] sm:$0xf]  ;;  %v3052_v3 = vld [vmem:[#allocation13 + $0x98] sm:$0xf0] }
 0x1c7   : > { %2156 = vmatpush.bf16.msrb.mxu0 %v3031_v60  ;;  %2195 = vmatpush.bf16.msrb.mxu2 %v3151_v22  ;;  %v2991_v2 = vor.u32 %v3374_v62, %v2988_v63  ;;  %v3055_v8 = vor.u32 %v3390_v0, %v3052_v3  ;;  %v3116_v22 = vld [vmem:[#allocation13 + $0x118] sm:$0xf0] }
 0x1ca   : > { %2176 = vmatpush.bf16.msrb.mxu1 %v3087_v9  ;;  %2213 = vmatpush.bf16.msrb.mxu3 %v3223_v15  ;;  %v3127_v9 = vor.u32 %v3408_v4, %v3124_v5  ;;  %v3191_v15 = vor.u32 %v3424_v10, %v3188_v11 }
 0x1cb   : > { %2157 = vmatpush.bf16.msrb.mxu0 %v3023_v7  ;;  %2196 = vmatpush.bf16.msrb.mxu2 %v3143_v41 }
 0x1ce   : > { %2177 = vmatpush.bf16.msrb.mxu1 %v3079_v49  ;;  %2214 = vmatpush.bf16.msrb.mxu3 %v3215_v26  ;;  %v3406_v49 = vld [vmem:[#allocation13 + $0x114] sm:$0xf]  ;;  %v3180_v26 = vld [vmem:[#allocation13 + $0x198] sm:$0xf0] }
 0x1cf   : > { %2158 = vmatpush.bf16.msrb.mxu0 %v3015_v19  ;;  %2197 = vmatpush.bf16.msrb.mxu2 %v3135_v57  ;;  %v3119_v27 = vor.u32 %v3406_v49, %v3116_v22  ;;  %v3183_v28 = vor.u32 %v3422_v25, %v3180_v26 }
 0x1d2   : > { %2178 = vmatpush.bf16.msrb.mxu1 %v3071_v35  ;;  %2215 = vmatpush.bf16.msrb.mxu3 %v3207_v43 }
 0x1d3   : > { %2159 = vmatpush.bf16.msrb.mxu0 %v3007_v30  ;;  %2198 = vmatpush.bf16.msrb.mxu2 %v3127_v9 }
 0x1d6   : > { %2179 = vmatpush.bf16.msrb.mxu1 %v3063_v52  ;;  %2216 = vmatpush.bf16.msrb.mxu3 %v3199_v61 }
 0x1d7   : > { %2160 = vmatpush.bf16.msrb.mxu0 %v2999_v50  ;;  %2199 = vmatpush.bf16.msrb.mxu2 %v3119_v27  ;;  %v3175_v50 = vor.u32 %v3420_v38, %v3172_v48 }
 0x1da   : > { %2180 = vmatpush.bf16.msrb.mxu1 %v3055_v8  ;;  %2217 = vmatpush.bf16.msrb.mxu3 %v3191_v15 }
 0x1db   : > { %2161 = vmatpush.bf16.msrb.mxu0 %v2991_v2  ;;  %2200 = vmatpush.bf16.msrb.mxu2 %v3111_v47 }
 0x1de   : > { %2181 = vmatpush.bf16.msrb.mxu1 %v3047_v44  ;;  %2218 = vmatpush.bf16.msrb.mxu3 %v3183_v28 }
 0x1df   : > { %2162 = vmatpush.bf16.msrb.mxu0 %v2983_v21 }
 0x1e2   : > { %2219 = vmatpush.bf16.msrb.mxu3 %v3175_v50 }
 0x231   : > { %v1598_v32 = vpop.f32.mrf.mxu0  ;;  %v1617_v34 = vpop.f32.mrf.mxu1 }
 0x232   : > { %v1599_v59 = vadd.f32 %v1598_v32, %v4143_v39  ;;  %v1618_v60 = vadd.f32 %v1617_v34, %v4145_v40 }
 0x234   : > { %v1665_v19 = vmax.f32 %v1599_v59, 0.0  ;;  %v1666_v20 = vmax.f32 %v1618_v60, 0.0 }
 0x238   : > { %v1636_v1 = vpop.f32.mrf.mxu2  ;;  %v1655_v46 = vpop.f32.mrf.mxu3 }
 0x239   : > { %v1600_v6 = vpop.f32.mrf.mxu0  ;;  %v1619_v7 = vpop.f32.mrf.mxu1  ;;  %v1637_v31 = vadd.f32 %v1636_v1, %v4147_v55  ;;  %v1656_v32 = vadd.f32 %v1655_v46, %v4149_v56 }
 0x23a   : > { %v1601_v13 = vadd.f32 %v1600_v6, %v4143_v39  ;;  %v1620_v14 = vadd.f32 %v1619_v7, %v4145_v40 }
 0x23b   : > { %v1667_v51 = vmax.f32 %v1637_v31, 0.0  ;;  %v1668_v52 = vmax.f32 %v1656_v32, 0.0 }
 0x23c   : > { %v1669_v23 = vmax.f32 %v1601_v13, 0.0  ;;  %v1670_v24 = vmax.f32 %v1620_v14, 0.0 }
 0x23e   : > { %v1681_v29 = vpack.c.bf16 %v1669_v23, %v1665_v19  ;;  %v1682_v30 = vpack.c.bf16 %v1670_v24, %v1666_v20 }
 0x240   : > { %v1638_v34 = vpop.f32.mrf.mxu2  ;;  %v1657_v35 = vpop.f32.mrf.mxu3  ;;  %2087 = vmatmul.bf16.vlgmr.msra.gmra.mxu0 %v1681_v29  ;;  %2106 = vmatmul.bf16.vlgmr.msra.gmra.mxu1 %v1682_v30 }
 0x241   : > { %v1639_v41 = vadd.f32 %v1638_v34, %v4147_v55  ;;  %v1658_v42 = vadd.f32 %v1657_v35, %v4149_v56  ;;  %v1603_v43 = vpop.f32.mrf.mxu0  ;;  %v1622_v45 = vpop.f32.mrf.mxu1 }
 0x242   : > { %v1604_v58 = vadd.f32 %v1603_v43, %v4143_v39  ;;  %v1623_v59 = vadd.f32 %v1622_v45, %v4145_v40 }
 0x243   : > { %v1671_v53 = vmax.f32 %v1639_v41, 0.0  ;;  %v1672_v54 = vmax.f32 %v1658_v42, 0.0 }
 0x244   : > { %v1673_v46 = vmax.f32 %v1604_v58, 0.0  ;;  %v1674_v2 = vmax.f32 %v1623_v59, 0.0 }
 0x245   : > { %v1683_v33 = vpack.c.bf16 %v1671_v53, %v1667_v51  ;;  %v1684_v57 = vpack.c.bf16 %v1672_v54, %v1668_v52 }
 0x247   : > { %2125 = vmatmul.bf16.vlgmr.msra.gmra.mxu2 %v1683_v33  ;;  %2144 = vmatmul.bf16.vlgmr.msra.gmra.mxu3 %v1684_v57 }
 0x248   : > { %v1641_v60 = vpop.f32.mrf.mxu2  ;;  %v1660_v61 = vpop.f32.mrf.mxu3 }
 0x249   : > { %v1605_v62 = vpop.f32.mrf.mxu0  ;;  %v1624_v63 = vpop.f32.mrf.mxu1  ;;  %v1642_v7 = vadd.f32 %v1641_v60, %v4147_v55  ;;  %v1661_v8 = vadd.f32 %v1660_v61, %v4149_v56 }
 0x24a   : > { %v1606_v0 = vadd.f32 %v1605_v62, %v4143_v39  ;;  %v1625_v1 = vadd.f32 %v1624_v63, %v4145_v40 }
 0x24b   : > { %v1675_v12 = vmax.f32 %v1642_v7, 0.0  ;;  %v1676_v40 = vmax.f32 %v1661_v8, 0.0 }
 0x24c   : > { %v1677_v3 = vmax.f32 %v1606_v0, 0.0  ;;  %v1678_v4 = vmax.f32 %v1625_v1, 0.0 }
 0x24e   : > { %v1685_v5 = vpack.c.bf16 %v1677_v3, %v1673_v46  ;;  %v1686_v6 = vpack.c.bf16 %v1678_v4, %v1674_v2 }
 0x250   : > { %v1643_v9 = vpop.f32.mrf.mxu2  ;;  %v1662_v10 = vpop.f32.mrf.mxu3  ;;  %2092 = vmatmul.bf16.gmra.mxu0 %v1685_v5  ;;  %2111 = vmatmul.bf16.gmra.mxu1 %v1686_v6 }
 0x251   : > { %v1644_v11 = vadd.f32 %v1643_v9, %v4147_v55  ;;  %v1663_v39 = vadd.f32 %v1662_v10, %v4149_v56  ;;  %v1753_v56 = vld [vmem:[%s4223_s8] sm:$0x3] }
 0x252   : > { %v1755_v18 = vperm.slane %v1753_v56, 0  ;;  %v1756_v60 = vperm.slane %v1753_v56, 1 }
 0x253   : > { %v1679_v13 = vmax.f32 %v1644_v11, 0.0  ;;  %v1680_v14 = vmax.f32 %v1663_v39, 0.0 }
 0x255   : > { %v1687_v15 = vpack.c.bf16 %v1679_v13, %v1675_v12  ;;  %v1688_v16 = vpack.c.bf16 %v1680_v14, %v1676_v40 }
 0x257   : > { %2130 = vmatmul.bf16.gmra.mxu2 %v1687_v15  ;;  %2149 = vmatmul.bf16.gmra.mxu3 %v1688_v16 }
 0x260   : > { %2163 = vmatmul.bf16.vlgmr.msrb.gmra.mxu0 %v1681_v29  ;;  %2182 = vmatmul.bf16.vlgmr.msrb.gmra.mxu1 %v1682_v30 }
 0x267   : > { %2201 = vmatmul.bf16.vlgmr.msrb.gmra.mxu2 %v1683_v33  ;;  %2220 = vmatmul.bf16.vlgmr.msrb.gmra.mxu3 %v1684_v57 }
 0x270   : > { %2168 = vmatmul.bf16.gmra.mxu0 %v1685_v5  ;;  %2187 = vmatmul.bf16.gmra.mxu1 %v1686_v6 }
 0x277   : > { %2206 = vmatmul.bf16.gmra.mxu2 %v1687_v15  ;;  %2225 = vmatmul.bf16.gmra.mxu3 %v1688_v16 }
 0x2bd   : > { %v2088_v17 = vpop.f32.mrf.mxu0  ;;  %v2107_v55 = vpop.f32.mrf.mxu1 }
 0x2be   : > { %v2089_v19 = vadd.f32 %v2088_v17, %v1755_v18 }
 0x2c0   : > { %v2108_v44 = vadd.f32 %v2107_v55, %v2089_v19 }
 0x2c5   : > { %v2090_v20 = vpop.f32.mrf.mxu0  ;;  %v2109_v21 = vpop.f32.mrf.mxu1 }
 0x2c6   : > { %v2091_v24 = vadd.f32 %v2090_v20, %v1755_v18 }
 0x2c8   : > { %v2110_v29 = vadd.f32 %v2109_v21, %v2091_v24 }
 0x2ca   : > { %v2126_v49 = vpop.f32.mrf.mxu2  ;;  %v2145_v22 = vpop.f32.mrf.mxu3 }
 0x2cb   : > { %v2127_v23 = vadd.f32 %v2126_v49, %v2108_v44 }
 0x2cd   : > { %v2146_v25 = vadd.f32 %v2145_v22, %v2127_v23  ;;  %v2093_v26 = vpop.f32.mrf.mxu0  ;;  %v2112_v27 = vpop.f32.mrf.mxu1 }
 0x2ce   : > { %v2094_v35 = vadd.f32 %v2093_v26, %v1755_v18 }
 0x2cf   : > { %v2231_v28 = vsub.f32 0.0, %v2146_v25 }
 0x2d0   : > { %v2113_v43 = vadd.f32 %v2112_v27, %v2094_v35 }
 0x2d1   : > { %v2239_v30 = vmul.f32 1.442695, %v2231_v28 }
 0x2d2   : > { %v2128_v31 = vpop.f32.mrf.mxu2  ;;  %v2147_v32 = vpop.f32.mrf.mxu3 }
 0x2d3   : > { %3554 = vpow2.f32 %v2239_v30  ;;  %v2129_v34 = vadd.f32 %v2128_v31, %v2110_v29 }
 0x2d5   : > { %v2148_v36 = vadd.f32 %v2147_v32, %v2129_v34  ;;  %v2095_v37 = vpop.f32.mrf.mxu0  ;;  %v2114_v41 = vpop.f32.mrf.mxu1 }
 0x2d6   : > { %v2096_v52 = vadd.f32 %v2095_v37, %v1755_v18 }
 0x2d7   : > { %v2233_v38 = vsub.f32 0.0, %v2148_v36 }
 0x2d8   : > { %v2115_v58 = vadd.f32 %v2114_v41, %v2096_v52 }
 0x2d9   : > { %v3555_v42 = vpop.eup %3554  ;;  %v2243_v45 = vmul.f32 1.442695, %v2233_v38 }
 0x2da   : > { %v2255_v47 = vadd.f32 1.0, %v3555_v42  ;;  %v2131_v48 = vpop.f32.mrf.mxu2  ;;  %v2150_v50 = vpop.f32.mrf.mxu3 }
 0x2db   : > { %3556 = vpow2.f32 %v2243_v45  ;;  %v2132_v51 = vadd.f32 %v2131_v48, %v2113_v43 }
 0x2dc   : > { %3558 = vrcp.f32 %v2255_v47 }
 0x2dd   : > { %v2151_v53 = vadd.f32 %v2150_v50, %v2132_v51  ;;  %v2164_v54 = vpop.f32.mrf.mxu0  ;;  %v2183_v61 = vpop.f32.mrf.mxu1 }
 0x2de   : > { %v2165_v2 = vadd.f32 %v2164_v54, %v1756_v60 }
 0x2df   : > { %v2235_v33 = vsub.f32 0.0, %v2151_v53 }
 0x2e0   : > { %v2184_v7 = vadd.f32 %v2183_v61, %v2165_v2 }
 0x2e1   : > { %v3557_v57 = vpop.eup %3556  ;;  %v2247_v59 = vmul.f32 1.442695, %v2235_v33 }
 0x2e2   : > { %v3559_v62 = vpop.eup %3558  ;;  %v2257_v63 = vadd.f32 1.0, %v3557_v57  ;;  %v2133_v0 = vpop.f32.mrf.mxu2 }
 0x2e3   : > { %v2152_v1 = vpop.f32.mrf.mxu3  ;;  %2271 = vst [vmem:[%s4171_s18] sm:$0xff] %v3559_v62  ;;  %3560 = vpow2.f32 %v2247_v59  ;;  %v2134_v46 = vadd.f32 %v2133_v0, %v2115_v58 }
 0x2e4   : > { %3562 = vrcp.f32 %v2257_v63 }
 0x2e5   : > { %v2153_v3 = vadd.f32 %v2152_v1, %v2134_v46  ;;  %v2166_v4 = vpop.f32.mrf.mxu0  ;;  %v2185_v40 = vpop.f32.mrf.mxu1 }
 0x2e6   : > { %v2167_v13 = vadd.f32 %v2166_v4, %v1756_v60 }
 0x2e7   : > { %v2237_v5 = vsub.f32 0.0, %v2153_v3 }
 0x2e8   : > { %v2186_v55 = vadd.f32 %v2185_v40, %v2167_v13 }
 0x2e9   : > { %v3561_v6 = vpop.eup %3560  ;;  %v2251_v8 = vmul.f32 1.442695, %v2237_v5 }
 0x2ea   : > { %v3563_v9 = vpop.eup %3562  ;;  %v2259_v10 = vadd.f32 1.0, %v3561_v6  ;;  %v2202_v11 = vpop.f32.mrf.mxu2 }
 0x2eb   : > { %v2221_v39 = vpop.f32.mrf.mxu3  ;;  %2273 = vst [vmem:[%s4171_s18 + $0x10] sm:$0xff] %v3563_v9  ;;  %3564 = vpow2.f32 %v2251_v8  ;;  %v2203_v12 = vadd.f32 %v2202_v11, %v2184_v7 }
 0x2ec   : > { %3566 = vrcp.f32 %v2259_v10 }
 0x2ed   : > { %v2222_v14 = vadd.f32 %v2221_v39, %v2203_v12  ;;  %v2169_v16 = vpop.f32.mrf.mxu0  ;;  %v2188_v23 = vpop.f32.mrf.mxu1 }
 0x2ee   : > { %v2170_v49 = vadd.f32 %v2169_v16, %v1756_v60 }
 0x2ef   : > { %v2232_v15 = vsub.f32 0.0, %v2222_v14 }
 0x2f0   : > { %v2189_v26 = vadd.f32 %v2188_v23, %v2170_v49 }
 0x2f1   : > { %v3565_v17 = vpop.eup %3564  ;;  %v2241_v56 = vmul.f32 1.442695, %v2232_v15 }
 0x2f2   : > { %v3567_v18 = vpop.eup %3566  ;;  %v2261_v19 = vadd.f32 1.0, %v3565_v17  ;;  %v2204_v20 = vpop.f32.mrf.mxu2 }
 0x2f3   : > { %v2223_v21 = vpop.f32.mrf.mxu3  ;;  %2275 = vst [vmem:[%s4171_s18 + $0x20] sm:$0xff] %v3567_v18  ;;  %3568 = vpow2.f32 %v2241_v56  ;;  %v2205_v44 = vadd.f32 %v2204_v20, %v2186_v55 }
 0x2f4   : > { %3570 = vrcp.f32 %v2261_v19 }
 0x2f5   : > { %v2224_v22 = vadd.f32 %v2223_v21, %v2205_v44  ;;  %v2171_v28 = vpop.f32.mrf.mxu0  ;;  %v2190_v38 = vpop.f32.mrf.mxu1 }
 0x2f6   : > { %v2172_v35 = vadd.f32 %v2171_v28, %v1756_v60 }
 0x2f7   : > { %v2234_v24 = vsub.f32 0.0, %v2224_v22 }
 0x2f8   : > { %v2191_v42 = vadd.f32 %v2190_v38, %v2172_v35 }
 0x2f9   : > { %v3569_v25 = vpop.eup %3568  ;;  %v2245_v27 = vmul.f32 1.442695, %v2234_v24 }
 0x2fa   : > { %v3571_v29 = vpop.eup %3570  ;;  %v2256_v30 = vadd.f32 1.0, %v3569_v25  ;;  %v2207_v31 = vpop.f32.mrf.mxu2 }
 0x2fb   : > { %v2226_v32 = vpop.f32.mrf.mxu3  ;;  %2277 = vst [vmem:[%s4171_s18 + $0x30] sm:$0xff] %v3571_v29  ;;  %3572 = vpow2.f32 %v2245_v27  ;;  %v2208_v34 = vadd.f32 %v2207_v31, %v2189_v26 }
 0x2fc   : > { %3574 = vrcp.f32 %v2256_v30 }
 0x2fd   : > { %v2227_v36 = vadd.f32 %v2226_v32, %v2208_v34 }
 0x2ff   : > { %v2236_v37 = vsub.f32 0.0, %v2227_v36 }
 0x301   : > { %v3573_v41 = vpop.eup %3572  ;;  %v2249_v43 = vmul.f32 1.442695, %v2236_v37 }
 0x302   : > { %v3575_v45 = vpop.eup %3574  ;;  %v2258_v47 = vadd.f32 1.0, %v3573_v41  ;;  %v2209_v48 = vpop.f32.mrf.mxu2 }
 0x303   : > { %2272 = vst [vmem:[%s4171_s18 + $0x8] sm:$0xff] %v3575_v45  ;;  %3576 = vpow2.f32 %v2249_v43  ;;  %v2210_v50 = vadd.f32 %v2209_v48, %v2191_v42  ;;  %v2228_v51 = vpop.f32.mrf.mxu3 }
 0x304   : > { %3578 = vrcp.f32 %v2258_v47 }
 0x305   : > { %v2229_v52 = vadd.f32 %v2228_v51, %v2210_v50 }
 0x307   : > { %v2238_v53 = vsub.f32 0.0, %v2229_v52 }
 0x309   : > { %v3577_v54 = vpop.eup %3576  ;;  %v2253_v33 = vmul.f32 1.442695, %v2238_v53 }
 0x30a   : > { %v3579_v57 = vpop.eup %3578  ;;  %v2260_v58 = vadd.f32 1.0, %v3577_v54 }
 0x30b   : > { %2274 = vst [vmem:[%s4171_s18 + $0x18] sm:$0xff] %v3579_v57  ;;  %3580 = vpow2.f32 %v2253_v33 }
 0x30c   : > { %3582 = vrcp.f32 %v2260_v58 }
 0x311   : > { %v3581_v59 = vpop.eup %3580 }
 0x312   : > { %v3583_v60 = vpop.eup %3582  ;;  %v2262_v61 = vadd.f32 1.0, %v3581_v59 }
 0x313   : > { %2276 = vst [vmem:[%s4171_s18 + $0x28] sm:$0xff] %v3583_v60 }
 0x314   : > { %3584 = vrcp.f32 %v2262_v61 }
 0x31a   : > { %v3585_v62 = vpop.eup %3584 }
 0x31b   : > { %2278 = vst [vmem:[%s4171_s18 + $0x38] sm:$0xff] %v3585_v62 }
 0x31c   : > { %3823 = shalt.err (!%p3820_p9)
}
 0x31d   : > { %s3888_s3 = smov 256   ;;  %s3889_s18 = smov 16  }
 0x31e   : > { %3464 = dma.vmem_to_hbm [thread:$0]  (%p4040_p4), %s2294_s9, 1024, %s2296_s14, %s2280_s2, %s3888_s3, %s3888_s3, %s3889_s18  }
 0x31f PF: > { %s2310_s26 = sand.u32 1, %s3862_s30   ;;  %p4245_p10 = scmp.ge.s32.totalorder %s3874_s12, 2 }
 0x320   : > { %s2311_s27 = scalar_lea.sflag [#allocation4], %s2310_s26 }
 0x321   : > { %p3490_p13 = pnand %p4245_p10, %p4044_p6 }
 0x323   : > { %p3491_p11 = pneg %p3490_p13 }
 0x325   : > { %3857 = dma.done.wait (%p3491_p11), %s2311_s27, 1024  }
 0x326   : > { %3859 = vsyncadd (%p3491_p11), %s2311_s27, 4294966272  ;;  %p25_p0 = scmp.ge.s32.totalorder %s4014_s20, 4   ;;  %s4246_s30 = smov %s3866_s10 }
 0x327   : > { %s4247_s10 = smov %s3870_s11  ;;  %s4248_s11 = smov %s4025_s15 }
 0x328   : > { %s4249_s12 = smov %s4014_s20  ;;  %27 = sbr.rel (!%p25_p0) target bundleno = 13 (0xd), region = 125 }
 0x32d   :  { %2317 = vsyncpa [#allocation3], 1 }
 0x32e   :  { %2319 = vsyncpa [#allocation3 + $0x1], 1 }
 0x32f   :  { %2320 = vsyncpa [#allocation6], 1 }
 0x330   :  { %2321 = vsyncpa [#allocation9], 1 }
 0x331   :  { %2322 = vsyncpa [#allocation12], 1 }
 0x332   :  { %2323 = vsyncpa [#allocation4], 1 }
 0x333   :  { %2325 = vsyncpa [#allocation4 + $0x1], 1 }

</bundles_post_ra>
